<compile_context>
chip_gen: v6e
topology: v6e:2x2x1
jax: 0.10.0
libtpu: 0.0.40
codegen_flags: <defaults>
</compile_context>

<pallas_src>
import functools

import jax
import jax.numpy as jnp
from jax.experimental import pallas as pl
from jax.experimental.pallas import tpu as pltpu


# ---------------------------------------------------------------------------
# Small helpers
# ---------------------------------------------------------------------------
def _round_up(x, m):
    return ((x + m - 1) // m) * m


def _vmem_capacity_bytes():
    try:
        return int(pltpu.get_tpu_info().vmem_capacity_bytes)
    except Exception:
        return 64 * 1024 * 1024  # conservative default (v7x per-core VMEM)


def _vmem_limit_bytes(requested):
    cap = _vmem_capacity_bytes()
    return int(min(int(requested), int(0.9 * cap)))


def _pad_rows(x, n_pad):
    n = x.shape[0]
    if n == n_pad:
        return x
    pad = [(0, n_pad - n)] + [(0, 0)] * (x.ndim - 1)
    return jnp.pad(x, pad)


def _pick_row_tile(n_pad):
    # Prefer big tiles, but keep >= 4 row-tiles so both v7x TensorCores get work.
    for t in (512, 256, 128):
        if n_pad % t == 0 and n_pad // t >= 4:
            return t
    for t in (512, 256, 128):
        if n_pad % t == 0:
            return t
    return n_pad


def _pick_k_tile(n_pad):
    for t in (512, 256, 128):
        if n_pad % t == 0:
            return t
    return n_pad


# ---------------------------------------------------------------------------
# Kernel 1a: fully fused LightGCN embedding (A and x VMEM-resident).
#   out = sum_l alpha[l] * x^(l),  x^(l+1) = A @ x^(l)
# A is read from HBM exactly once for all layers; no per-layer stack is materialized.
# ---------------------------------------------------------------------------
def _embed_resident_kernel(alpha_ref, a_ref, x0_ref, o_ref):
    num_layers = alpha_ref.shape[0] - 1            # static
    a = a_ref[...]                                 # (N_pad, N_pad) bf16, VMEM-resident
    x = x0_ref[...]                                # (N_pad, D) f32
    acc = alpha_ref[0] * x
    for l in range(num_layers):                    # statically unrolled (L is small)
        x = jnp.dot(a, x.astype(jnp.bfloat16),
                    preferred_element_type=jnp.float32)
        acc = acc + alpha_ref[l + 1] * x
    o_ref[...] = acc


def lightgcn_embed_resident(a_bf16, x0, alpha):
    n_pad, d = x0.shape
    a_bytes = n_pad * n_pad * 2
    x_bytes = n_pad * d * 4
    limit = _vmem_limit_bytes(a_bytes + 8 * x_bytes + (16 << 20))
    return pl.pallas_call(
        _embed_resident_kernel,
        out_shape=jax.ShapeDtypeStruct((n_pad, d), jnp.float32),
        in_specs=[pl.BlockSpec(memory_space=pltpu.MemorySpace.SMEM),   # alpha (L+1,)
                  pl.BlockSpec(memory_space=pltpu.MemorySpace.VMEM),   # A bf16 resident
                  pl.BlockSpec(memory_space=pltpu.MemorySpace.VMEM)],  # x0 resident
        out_specs=pl.BlockSpec(memory_space=pltpu.MemorySpace.VMEM),
        compiler_params=pltpu.CompilerParams(vmem_limit_bytes=limit),
    )(alpha, a_bf16, x0)


# ---------------------------------------------------------------------------
# Kernel 1b: tiled fallback for a single LGConv layer with fused alpha accumulation.
#   x_next = A @ x ;  acc_out = acc_in + alpha_l * x_next
# A tiles are bf16, x stays VMEM-resident for the whole call, MXU accumulates in f32 scratch.
# ---------------------------------------------------------------------------
def _lgconv_step_kernel(alpha_ref, a_ref, x_ref, acc_in_ref,
                        xnext_ref, acc_out_ref, mm_ref):
    k = pl.program_id(1)
    tk = a_ref.shape[1]

    @pl.when(k == 0)
    def _():
        mm_ref[...] = jnp.zeros_like(mm_ref)

    off = pl.multiple_of(k * tk, tk)
    xk = x_ref[pl.ds(off, tk), :].astype(jnp.bfloat16)   # slice the resident x
    mm_ref[...] += jnp.dot(a_ref[...], xk, preferred_element_type=jnp.float32)

    @pl.when(k == pl.num_programs(1) - 1)
    def _():
        xn = mm_ref[...]
        xnext_ref[...] = xn
        acc_out_ref[...] = acc_in_ref[...] + alpha_ref[0] * xn


def _lgconv_step(a_bf16, x, acc, alpha_l, *, tm, tk):
    n_pad, d = x.shape
    assert n_pad % tm == 0 and n_pad % tk == 0
    x_bytes = n_pad * d * 4
    limit = _vmem_limit_bytes(
        2 * x_bytes + 4 * tm * tk * 2 + 8 * tm * d * 4 + (16 << 20))
    x_next, acc_out = pl.pallas_call(
        _lgconv_step_kernel,
        out_shape=(jax.ShapeDtypeStruct((n_pad, d), jnp.float32),
                   jax.ShapeDtypeStruct((n_pad, d), jnp.float32)),
        grid_spec=pltpu.PrefetchScalarGridSpec(
            num_scalar_prefetch=0,
            grid=(n_pad // tm, n_pad // tk),
            in_specs=[pl.BlockSpec(memory_space=pltpu.MemorySpace.SMEM),   # alpha_l (1,)
                      pl.BlockSpec((tm, tk), lambda i, k: (i, k)),         # A tile (bf16)
                      pl.BlockSpec((n_pad, d), lambda i, k: (0, 0)),       # x resident
                      pl.BlockSpec((tm, d), lambda i, k: (i, 0))],         # acc_in tile
            out_specs=[pl.BlockSpec((tm, d), lambda i, k: (i, 0)),
                       pl.BlockSpec((tm, d), lambda i, k: (i, 0))],
            scratch_shapes=[pltpu.VMEM((tm, d), jnp.float32)]),
        compiler_params=pltpu.CompilerParams(
            dimension_semantics=("parallel", "arbitrary"),
            vmem_limit_bytes=limit),
    )(alpha_l, a_bf16, x, acc)
    return x_next, acc_out


def lightgcn_embed_tiled(a_bf16, x0, alpha, num_layers, *, tm=None, tk=None):
    n_pad, d = x0.shape
    tm = tm or _pick_row_tile(n_pad)
    tk = tk or _pick_k_tile(n_pad)
    x = x0
    acc = alpha[0] * x0
    for l in range(num_layers):
        x, acc = _lgconv_step(a_bf16, x, acc, alpha[l + 1].reshape(1), tm=tm, tk=tk)
    return acc


# ---------------------------------------------------------------------------
# Kernel 2: per-edge ranking  rank_e = sum_d src[e, d] * dst[e, d]
# ---------------------------------------------------------------------------
def _rank_kernel(src_ref, dst_ref, o_ref):
    o_ref[...] = jnp.sum(src_ref[...] * dst_ref[...], axis=-1, keepdims=True)


def pair_rank(src_emb, dst_emb):
    e, d = src_emb.shape
    e_pad = _round_up(max(e, 128), 128)
    te = next(t for t in (1024, 512, 256, 128) if e_pad % t == 0)
    src = _pad_rows(src_emb, e_pad)
    dst = _pad_rows(dst_emb, e_pad)
    out = pl.pallas_call(
        _rank_kernel,
        out_shape=jax.ShapeDtypeStruct((e_pad, 1), jnp.float32),
        grid_spec=pltpu.PrefetchScalarGridSpec(
            num_scalar_prefetch=0,
            grid=(e_pad // te,),
            in_specs=[pl.BlockSpec((te, d), lambda i: (i, 0)),
                      pl.BlockSpec((te, d), lambda i: (i, 0))],
            out_specs=pl.BlockSpec((te, 1), lambda i: (i, 0))),
        compiler_params=pltpu.CompilerParams(
            dimension_semantics=("parallel",)),
    )(src, dst)
    return out[:e, 0]


# ---------------------------------------------------------------------------
# Glue: gcn_norm (add_self_loops=False, PyG LGConv default) -> dense A (size n x n)
# ---------------------------------------------------------------------------
def build_norm_adj(edge_index, n, edge_weight=None):
    row, col = edge_index[0], edge_index[1]
    if edge_weight is None:
        edge_weight = jnp.ones(row.shape[0], dtype=jnp.float32)
    edge_weight = edge_weight.astype(jnp.float32)
    deg = jnp.zeros((n,), jnp.float32).at[col].add(edge_weight)
    deg_inv_sqrt = jnp.where(deg > 0, 1.0 / jnp.sqrt(deg), 0.0)
    norm = deg_inv_sqrt[row] * edge_weight * deg_inv_sqrt[col]
    # out[i] = sum over edges (row=j -> col=i) of norm * x[j]  =>  A[col, row] += norm
    a = jnp.zeros((n, n), jnp.float32).at[col, row].add(norm)
    return a


# ---------------------------------------------------------------------------
# LightGCN forward (matches torch LightGCN.forward semantics)
# ---------------------------------------------------------------------------
@functools.partial(jax.jit,
                   static_argnames=("num_layers", "force_tiled", "tm", "tk"))
def lightgcn_forward(embedding_weight, alpha, edge_index, edge_label_index,
                     num_layers, edge_weight=None, *,
                     force_tiled=False, tm=None, tk=None):
    num_nodes, d = embedding_weight.shape
    assert alpha.shape[0] == num_layers + 1
    n_pad = _round_up(max(num_nodes, 128), 128)

    a = build_norm_adj(edge_index, n_pad, edge_weight)
    a_bf16 = a.astype(jnp.bfloat16)      # bf16 adjacency: halves HBM traffic of the matmul
    x0 = _pad_rows(embedding_weight.astype(jnp.float32), n_pad)
    alpha = alpha.astype(jnp.float32)

    a_bytes = n_pad * n_pad * 2
    x_bytes = n_pad * d * 4
    cap = _vmem_capacity_bytes()
    use_resident = (not force_tiled) and (a_bytes + 6 * x_bytes + (4 << 20) <= cap // 3)

    if use_resident:
        out = lightgcn_embed_resident(a_bf16, x0, alpha)   # one HBM read of A for all layers
    else:
        out = lightgcn_embed_tiled(a_bf16, x0, alpha, num_layers, tm=tm, tk=tk)

    # Gather node-pair embeddings (XLA gather), then Pallas row-wise dot product.
    # NOTE: for very large ranking batches this gather could be fused into pair_rank via
    #       scalar-prefetch row gathers; at these sizes the A @ x matmul dominates HBM traffic.
    src = jnp.take(out, edge_label_index[0], axis=0)
    dst = jnp.take(out, edge_label_index[1], axis=0)
    return pair_rank(src, dst)


# Pure-JAX f32 reference for correctness checking.
def lightgcn_reference(embedding_weight, alpha, edge_index, edge_label_index,
                       num_layers, edge_weight=None):
    num_nodes, _ = embedding_weight.shape
    a = build_norm_adj(edge_index, num_nodes, edge_weight)
    x = embedding_weight.astype(jnp.float32)
    out = alpha[0] * x
    for i in range(num_layers):
        x = a @ x
        out = out + alpha[i + 1] * x
    src = out[edge_label_index[0]]
    dst = out[edge_label_index[1]]
    return (src * dst).sum(-1)


if __name__ == "__main__":
    num_nodes = 256
    embedding_dim = 64
    num_layers = 2
    num_undirected_edges = 256  # -> 512 directed edges

    key = jax.random.PRNGKey(0)
    k_emb, k_src, k_dst = jax.random.split(key, 3)

    # Xavier-uniform init of the Embedding weight (deterministic).
    bound = (6.0 / (num_nodes + embedding_dim)) ** 0.5
    embedding_weight = jax.random.uniform(
        k_emb, (num_nodes, embedding_dim), jnp.float32, -bound, bound)

    # alpha = 1 / (num_layers + 1)  (the default uniform buffer)
    alpha = jnp.full((num_layers + 1,), 1.0 / (num_layers + 1), jnp.float32)

    # Deterministic random graph, symmetrized (both directions).
    src = jax.random.randint(k_src, (num_undirected_edges,), 0, num_nodes)
    dst = jax.random.randint(k_dst, (num_undirected_edges,), 0, num_nodes)
    edge_index = jnp.stack([jnp.concatenate([src, dst]),
                            jnp.concatenate([dst, src])], axis=0).astype(jnp.int32)
    # edge_label_index=None in torch -> use edge_index itself
    edge_label_index = edge_index

    rank_ref = lightgcn_reference(embedding_weight, alpha, edge_index,
                                  edge_label_index, num_layers)

    # Path 1: fused VMEM-resident kernel (default at this size).
    rank = lightgcn_forward(embedding_weight, alpha, edge_index,
                            edge_label_index, num_layers)
    rank = jax.block_until_ready(rank)
    assert rank.shape == (edge_label_index.shape[1],)
    # bf16 adjacency / activations -> loosened tolerance vs. the f32 reference.
    assert jnp.allclose(rank, rank_ref, atol=1e-2, rtol=2e-2), \
        float(jnp.max(jnp.abs(rank - rank_ref)))

    # Path 2: tiled fallback (forced, small tiles so the k-accumulation loop is exercised).
    rank_t = lightgcn_forward(embedding_weight, alpha, edge_index,
                              edge_label_index, num_layers,
                              force_tiled=True, tm=128, tk=128)
    rank_t = jax.block_until_ready(rank_t)
    assert rank_t.shape == (edge_label_index.shape[1],)
    assert jnp.allclose(rank_t, rank_ref, atol=1e-2, rtol=2e-2), \
        float(jnp.max(jnp.abs(rank_t - rank_ref)))

    print("KERNEL_OK")
</pallas_src>

<mosaic_0001>
module attributes {stable_mosaic.version = 11 : i64} {
  func.func private @main(%arg0: i32) attributes {dimension_semantics = [#tpu.dimension_semantics<core_parallel>], iteration_bounds = array<i64: 2>, tpu.core_type = #tpu.core_type<sc_scalar_subcore>, window_params = []} {
    return
  }
}

module attributes {stable_mosaic.version = 11 : i64} {
  func.func private @main(%arg0: i32) attributes {dimension_semantics = [#tpu.dimension_semantics<core_parallel>], iteration_bounds = array<i64: 2>, tpu.core_type = #tpu.core_type<sc_scalar_subcore>, window_params = []} {
    return
  }
}

module attributes {stable_mosaic.version = 11 : i64} {
  func.func @_embed_resident_kernel(%arg0: memref<3xf32, #tpu.memory_space<smem>>, %arg1: memref<256x256xbf16, #tpu.memory_space<vmem>>, %arg2: memref<256x64xf32, #tpu.memory_space<vmem>>, %arg3: memref<256x64xf32, #tpu.memory_space<vmem>>) attributes {dimension_semantics = [], scalar_prefetch = 0 : i64, scratch_operands = 0 : i64, tpu.core_type = #tpu.core_type<tc>} {
    %c0 = arith.constant 0 : index
    %c0_0 = arith.constant 0 : index
    %0 = vector.load %arg1[%c0, %c0_0] : memref<256x256xbf16, #tpu.memory_space<vmem>>, vector<256x256xbf16>
    %c0_1 = arith.constant 0 : index
    %c0_2 = arith.constant 0 : index
    %1 = vector.load %arg2[%c0_1, %c0_2] : memref<256x64xf32, #tpu.memory_space<vmem>>, vector<256x64xf32>
    %c0_3 = arith.constant 0 : index
    %2 = memref.load %arg0[%c0_3] : memref<3xf32, #tpu.memory_space<smem>>
    %3 = vector.broadcast %2 : f32 to vector<256x64xf32>
    %4 = arith.mulf %3, %1 : vector<256x64xf32>
    %5 = arith.truncf %1 : vector<256x64xf32> to vector<256x64xbf16>
    %cst = arith.constant dense<0.000000e+00> : vector<256x64xf32>
    %6 = tpu.matmul %0, %5, %cst {dimension_numbers = #tpu.dot_dimension_numbers<[1], [0], [0], [1], [0, 0, 1, 1], [], []>} : vector<256x256xbf16>, vector<256x64xbf16>, vector<256x64xf32> -> vector<256x64xf32>
    %c1 = arith.constant 1 : index
    %7 = memref.load %arg0[%c1] : memref<3xf32, #tpu.memory_space<smem>>
    %8 = vector.broadcast %7 : f32 to vector<256x64xf32>
    %9 = arith.mulf %8, %6 : vector<256x64xf32>
    %10 = arith.addf %4, %9 : vector<256x64xf32>
    %11 = arith.truncf %6 : vector<256x64xf32> to vector<256x64xbf16>
    %cst_4 = arith.constant dense<0.000000e+00> : vector<256x64xf32>
    %12 = tpu.matmul %0, %11, %cst_4 {dimension_numbers = #tpu.dot_dimension_numbers<[1], [0], [0], [1], [0, 0, 1, 1], [], []>} : vector<256x256xbf16>, vector<256x64xbf16>, vector<256x64xf32> -> vector<256x64xf32>
    %c2 = arith.constant 2 : index
    %13 = memref.load %arg0[%c2] : memref<3xf32, #tpu.memory_space<smem>>
    %14 = vector.broadcast %13 : f32 to vector<256x64xf32>
    %15 = arith.mulf %14, %12 : vector<256x64xf32>
    %16 = arith.addf %10, %15 : vector<256x64xf32>
    %c0_5 = arith.constant 0 : index
    %c0_6 = arith.constant 0 : index
    %17 = vector.load %arg3[%c0_5, %c0_6] : memref<256x64xf32, #tpu.memory_space<vmem>>, vector<256x64xf32>
    tpu.vector_store %arg3[%c0_5, %c0_6], %16 {strides = array<i32>} : memref<256x64xf32, #tpu.memory_space<vmem>>, vector<256x64xf32>,
    return
  }
}

module attributes {stable_mosaic.version = 11 : i64} {
  func.func @_rank_kernel(%arg0: i32, %arg1: memref<512x64xf32, #tpu.memory_space<vmem>>, %arg2: memref<512x64xf32, #tpu.memory_space<vmem>>, %arg3: memref<512x1xf32, #tpu.memory_space<vmem>>) attributes {dimension_semantics = [#tpu.dimension_semantics<parallel>], iteration_bounds = array<i64: 1>, scalar_prefetch = 0 : i64, scratch_operands = 0 : i64, tpu.core_type = #tpu.core_type<tc>, window_params = [{transform_indices = @transform_0, window_bounds = array<i64: 512, 64>}, {transform_indices = @transform_1, window_bounds = array<i64: 512, 64>}, {transform_indices = @transform_2, window_bounds = array<i64: 512, 1>}]} {
    %c0 = arith.constant 0 : index
    %c0_0 = arith.constant 0 : index
    %0 = vector.load %arg1[%c0, %c0_0] : memref<512x64xf32, #tpu.memory_space<vmem>>, vector<512x64xf32>
    %c0_1 = arith.constant 0 : index
    %c0_2 = arith.constant 0 : index
    %1 = vector.load %arg2[%c0_1, %c0_2] : memref<512x64xf32, #tpu.memory_space<vmem>>, vector<512x64xf32>
    %2 = arith.mulf %0, %1 : vector<512x64xf32>
    %cst = arith.constant dense<0.000000e+00> : vector<512xf32>
    %3 = vector.multi_reduction <add>, %2, %cst [1] : vector<512x64xf32> to vector<512xf32>
    %4 = vector.shape_cast %3 : vector<512xf32> to vector<512x1xf32>
    %c0_3 = arith.constant 0 : index
    %c0_4 = arith.constant 0 : index
    %5 = vector.load %arg3[%c0_3, %c0_4] : memref<512x1xf32, #tpu.memory_space<vmem>>, vector<512x1xf32>
    tpu.vector_store %arg3[%c0_3, %c0_4], %4 {strides = array<i32>} : memref<512x1xf32, #tpu.memory_space<vmem>>, vector<512x1xf32>,
    return
  }
  func.func @transform_0(%arg0: i32) -> (i32, i32) {
    %c0_i32 = arith.constant 0 : i32
    %c0_i32_0 = arith.constant 0 : i32
    return %arg0, %c0_i32 : i32, i32
  }
  func.func @transform_1(%arg0: i32) -> (i32, i32) {
    %c0_i32 = arith.constant 0 : i32
    %c0_i32_0 = arith.constant 0 : i32
    return %arg0, %c0_i32 : i32, i32
  }
  func.func @transform_2(%arg0: i32) -> (i32, i32) {
    %c0_i32 = arith.constant 0 : i32
    %c0_i32_0 = arith.constant 0 : i32
    return %arg0, %c0_i32 : i32, i32
  }
}

</mosaic_0001>

<bundles_post_ra>
// kernel: mul.1
= control target key start
LH: loop header
LB: loop body
LE: loop exit
PB: predicated region body
PF: predicated region fallthrough
CT: control target
= control target key end

     0   :  { %s34_s0 = inlined_call_operand.vmem [shape: f32[512], index: 0, kind: input, shape index: {}]   ;;  %s35_s1 = inlined_call_operand.vmem [shape: f32[512], index: 1, kind: input, shape index: {}]   ;;  %s36_s2 = inlined_call_operand.vmem [shape: f32[512], index: 2, kind: output, shape index: {}]  }
   0x1   :  { %v3_v0 = vld [vmem:[%s34_s0] sm:$0xf] }
   0x2   :  { %v4_v1 = vld [vmem:[%s35_s1] sm:$0xf] }
   0x3   :  { %v7_v2 = vmul.f32 %v4_v1, %v3_v0 }
   0x5   :  { %9 = vst [vmem:[%s36_s2] sm:$0xf] %v7_v2 }

// kernel: lightgcn_forward.2
= control target key start
LH: loop header
LB: loop body
LE: loop exit
PB: predicated region body
PF: predicated region fallthrough
CT: control target
= control target key end

     0   :  { %8 = vsyncpa [#allocation3], 0  ;;  %s2027_s0 = inlined_call_operand.vmem [shape: f32[3], index: 0, kind: input, shape index: {}]   ;;  %s2028_s1 = inlined_call_operand.vmem [shape: bf16[256,256], index: 1, kind: input, shape index: {}]   ;;  %s2029_s2 = inlined_call_operand.vmem [shape: f32[256,64], index: 2, kind: input, shape index: {}]   ;;  %s2030_s3 = inlined_call_operand.vmem [shape: f32[256,64], index: 3, kind: output, shape index: {}]  }
   0x1   :  { %s15_s14 = sshll.u32 %s2027_s0, 4  ;;  %s16_s14 = int_to_ptr.vmem [resolvable:$true] %s15_s14 }
   0x2   :  { %s1117_s15 = scalar_lea.vmem %s16_s14, 16  ;;  %p1122_p1 = scmp.lt.s32.totalorder %s16_s14, %s16_s14 }
   0x3   :  { %p1118_p0 = scmp.ne.s32.totalorder %s16_s14, %s1117_s15  ;;  %p1123_p2 = scmp.lt.s32.totalorder %s1117_s15, %s1117_s15 }
   0x5   :  { %p1124_p3 = por %p1123_p2, %p1122_p1 }
   0x7   :  { %p1125_p4 = pnand %p1124_p3, %p1118_p0 }
   0x9   :  { %1128 = shalt.err (!%p1125_p4)
}
   0xa   :  { %s1131_s16 = smov [#allocation2]  }
   0xb   :  { %18 = dma.vmem_to_smem %s16_s14, 16, %s1131_s16, [#allocation3]  }
   0xc   :  { %1129 = dma.done.wait [#allocation3], 16  }
   0xd   :  { %1130 = vsyncadd [#allocation3], 4294967280 }
   0xe   :  { %26 = sfence }
   0xf   :  { %v90_v0 = vld [vmem:[%s2029_s2 + $0xf0] sm:$0xff]  ;;  %v91_v1 = vld [vmem:[%s2029_s2 + $0xf8] sm:$0xff]  ;;  %s92_s0 = sld [smem:[#allocation2]]  ;;  %v88_v5 = vld [vmem:[%s2029_s2 + $0xe0] sm:$0xff]  ;;  %vm772_vm0 = vcmask 523264  }
  0x10   :  { %v1164_v2 = vld [vmem:[%s2029_s2 + $0x70] sm:$0xff]  ;;  %v141_v3 = vpack.c.bf16 %v91_v1, %v90_v0  ;;  %v1169_v4 = vld [vmem:[%s2029_s2 + $0x78] sm:$0xff]  ;;  %v89_v6 = vld [vmem:[%s2029_s2 + $0xe8] sm:$0xff] }
  0x11   :  { %v133_v7 = vpack.c.bf16 %v1169_v4, %v1164_v2  ;;  %v140_v8 = vpack.c.bf16 %v89_v6, %v88_v5  ;;  %v1182_v9 = vld [vmem:[%s2029_s2 + $0x60] sm:$0xff]  ;;  %v1187_v10 = vld [vmem:[%s2029_s2 + $0x68] sm:$0xff]  ;;  %v86_v11 = vld [vmem:[%s2029_s2 + $0xd0] sm:$0xff] }
  0x12   :  { %844 = vmatprep.subr.bf16.mxu0 %v141_v3  ;;  %v87_v12 = vld [vmem:[%s2029_s2 + $0xd8] sm:$0xff]  ;;  %v132_v13 = vpack.c.bf16 %v1187_v10, %v1182_v9  ;;  %v1200_v15 = vld [vmem:[%s2029_s2 + $0x50] sm:$0xff]  ;;  %v84_v18 = vld [vmem:[%s2029_s2 + $0xc0] sm:$0xff] }
  0x13   :  { %845 = vmatpush3.bf16.msra.mxu0 %v133_v7  ;;  %v139_v14 = vpack.c.bf16 %v87_v12, %v86_v11  ;;  %v1205_v16 = vld [vmem:[%s2029_s2 + $0x58] sm:$0xff]  ;;  %v85_v19 = vld [vmem:[%s2029_s2 + $0xc8] sm:$0xff]  ;;  %v1238_v28 = vld [vmem:[%s2029_s2 + $0x40] sm:$0xff] }
  0x14   :  { %846 = vmatprep.subr.bf16.mxu0 %v140_v8  ;;  %v131_v24 = vpack.c.bf16 %v1205_v16, %v1200_v15  ;;  %v138_v27 = vpack.c.bf16 %v85_v19, %v84_v18  ;;  %v1243_v29 = vld [vmem:[%s2029_s2 + $0x48] sm:$0xff]  ;;  %v82_v30 = vld [vmem:[%s2029_s2 + $0xb0] sm:$0xff]  ;;  %v83_v33 = vld [vmem:[%s2029_s2 + $0xb8] sm:$0xff] }
  0x15   :  { %v1207_v17 = vstv %s92_s0  ;;  %v80_v34 = vld [vmem:[%s2029_s2 + $0xa0] sm:$0xff]  ;;  %v1269_v37 = vld [vmem:[%s2029_s2 + $0x30] sm:$0xff]  ;;  %v1274_v38 = vld [vmem:[%s2029_s2 + $0x38] sm:$0xff]  ;;  %v130_v41 = vpack.c.bf16 %v1243_v29, %v1238_v28  ;;  %v137_v45 = vpack.c.bf16 %v83_v33, %v82_v30 }
  0x16   :  { %v1216_v20 = vmul.f32 %v1207_v17, %v90_v0  ;;  %v1219_v21 = vmul.f32 %v1207_v17, %v91_v1  ;;  %v1222_v22 = vmul.f32 %v1207_v17, %v88_v5  ;;  %v1225_v23 = vmul.f32 %v1207_v17, %v89_v6  ;;  %v81_v39 = vld [vmem:[%s2029_s2 + $0xa8] sm:$0xff]  ;;  %v78_v44 = vld [vmem:[%s2029_s2 + $0x90] sm:$0xff]  ;;  %v79_v46 = vld [vmem:[%s2029_s2 + $0x98] sm:$0xff] }
  0x17   :  { %847 = vmatpush3.bf16.msra.mxu0 %v132_v13  ;;  %v1230_v25 = vmul.f32 %v1207_v17, %v86_v11  ;;  %v1233_v26 = vmul.f32 %v1207_v17, %v87_v12  ;;  %v1249_v31 = vmul.f32 %v1207_v17, %v84_v18  ;;  %v1252_v32 = vmul.f32 %v1207_v17, %v85_v19  ;;  %v1071_v40 = vld [vmem:[%s2028_s1 + $0x4] ss:$8 sps:$4 sm:$0xff]   ;;  %v1331_v58 = vld [vmem:[%s2029_s2 + $0x10] sm:$0xff]  ;;  %v1336_v60 = vld [vmem:[%s2029_s2 + $0x18] sm:$0xff] }
  0x18   :  { %848 = vmatprep.subr.bf16.mxu0 %v139_v14  ;;  %v1261_v35 = vmul.f32 %v1207_v17, %v82_v30  ;;  %v1264_v36 = vmul.f32 %v1207_v17, %v83_v33  ;;  %v1285_v42 = vmul.f32 %v1207_v17, %v80_v34  ;;  %v1288_v43 = vmul.f32 %v1207_v17, %v81_v39  ;;  %v76_v49 = vld [vmem:[%s2029_s2 + $0x80] sm:$0xff]  ;;  %v77_v50 = vld [vmem:[%s2029_s2 + $0x88] sm:$0xff]  ;;  %v1360_v5 = vld [vmem:[%s2028_s1 + $0x14] ss:$8 sps:$4 sm:$0xff]  }
  0x19   :  { %v1297_v47 = vmul.f32 %v1207_v17, %v78_v44  ;;  %v1300_v48 = vmul.f32 %v1207_v17, %v79_v46  ;;  %334 = vmatprep.mubr.bf16.mxu0 %v1071_v40  ;;  %v1309_v51 = vmul.f32 %v1207_v17, %v76_v49  ;;  %v1312_v52 = vmul.f32 %v1207_v17, %v77_v50  ;;  %v1319_v54 = vld [vmem:[%s2029_s2 + $0x20] sm:$0xff]  ;;  %v1324_v56 = vld [vmem:[%s2029_s2 + $0x28] sm:$0xff]  ;;  %v1367_v6 = vld [vmem:[%s2028_s1 + $0x10] ss:$8 sps:$4 sm:$0xff]  }
  0x1a   :  { %577 = vmatprep.mubr.bf16.mxu1 %v1071_v40  ;;  %v129_v53 = vpack.c.bf16 %v1274_v38, %v1269_v37  ;;  %v136_v55 = vpack.c.bf16 %v81_v39, %v80_v34  ;;  %v128_v57 = vpack.c.bf16 %v1324_v56, %v1319_v54  ;;  %v135_v59 = vpack.c.bf16 %v79_v46, %v78_v44  ;;  %v1343_v62 = vld [vmem:[%s2029_s2] sm:$0xff]  ;;  %v1348_v0 = vld [vmem:[%s2029_s2 + $0x8] sm:$0xff]  ;;  %v1384_v11 = vld [vmem:[%s2028_s1 + $0x34] ss:$8 sps:$4 sm:$0xff]   ;;  %s842_s2 = sld [smem:[#allocation2 + $0x1]] }
  0x1b   :  { %849 = vmatpush3.bf16.msra.mxu0 %v131_v24  ;;  %v127_v61 = vpack.c.bf16 %v1336_v60, %v1331_v58  ;;  %v134_v63 = vpack.c.bf16 %v77_v50, %v76_v49  ;;  %v126_v1 = vpack.c.bf16 %v1348_v0, %v1343_v62  ;;  %v1355_v3 = vld [vmem:[%s2028_s1] ss:$8 sps:$4 sm:$0xff]   ;;  %v1372_v7 = vld [vmem:[%s2028_s1 + $0x24] ss:$8 sps:$4 sm:$0xff]   ;;  %v1391_v12 = vld [vmem:[%s2028_s1 + $0x30] ss:$8 sps:$4 sm:$0xff]  }
  0x1c   :  { %850 = vmatprep.subr.bf16.mxu0 %v138_v27  ;;  %v1379_v8 = vld [vmem:[%s2028_s1 + $0x20] ss:$8 sps:$4 sm:$0xff]   ;;  %v1396_v13 = vld [vmem:[%s2028_s1 + $0x44] ss:$8 sps:$4 sm:$0xff]   ;;  %v1408_v18 = vld [vmem:[%s2028_s1 + $0x54] ss:$8 sps:$4 sm:$0xff]  }
  0x1d   :  { %v1403_v14 = vld [vmem:[%s2028_s1 + $0x40] ss:$8 sps:$4 sm:$0xff]   ;;  %v1415_v19 = vld [vmem:[%s2028_s1 + $0x50] ss:$8 sps:$4 sm:$0xff]   ;;  %v1420_v24 = vld [vmem:[%s2028_s1 + $0x64] ss:$8 sps:$4 sm:$0xff]  }
  0x1e   :  { %v1427_v27 = vld [vmem:[%s2028_s1 + $0x60] ss:$8 sps:$4 sm:$0xff]   ;;  %v1432_v30 = vld [vmem:[%s2028_s1 + $0x74] ss:$8 sps:$4 sm:$0xff]   ;;  %v1439_v33 = vld [vmem:[%s2028_s1 + $0x70] ss:$8 sps:$4 sm:$0xff]  }
  0x1f   :  { %851 = vmatpush3.bf16.msra.mxu0 %v130_v41  ;;  %2048 = vst [vmem:[#allocation5_spill] sm:$0xff] %v1439_v33  ;;  %v1444_v34 = vld [vmem:[%s2028_s1 + $0x84] ss:$8 sps:$4 sm:$0xff]   ;;  %v1451_v39 = vld [vmem:[%s2028_s1 + $0x80] ss:$8 sps:$4 sm:$0xff]  }
  0x20   :  { %852 = vmatprep.subr.bf16.mxu0 %v137_v45  ;;  %2049 = vst [vmem:[#allocation6_spill] sm:$0xff] %v1444_v34  ;;  %2050 = vst [vmem:[#allocation7_spill] sm:$0xff] %v1451_v39  ;;  %v1456_v40 = vld [vmem:[%s2028_s1 + $0x94] ss:$8 sps:$4 sm:$0xff]   ;;  %v1463_v41 = vld [vmem:[%s2028_s1 + $0x90] ss:$8 sps:$4 sm:$0xff]  }
  0x21   :  { %2051 = vst [vmem:[#allocation8_spill] sm:$0xff] %v1456_v40  ;;  %2052 = vst [vmem:[#allocation9_spill] sm:$0xff] %v1463_v41  ;;  %v1468_v44 = vld [vmem:[%s2028_s1 + $0xa4] ss:$8 sps:$4 sm:$0xff]   ;;  %v1475_v45 = vld [vmem:[%s2028_s1 + $0xa0] ss:$8 sps:$4 sm:$0xff]  }
  0x22   :  { %2053 = vst [vmem:[#allocation10_spill] sm:$0xff] %v1468_v44  ;;  %2054 = vst [vmem:[#allocation11_spill] sm:$0xff] %v1475_v45  ;;  %v1480_v46 = vld [vmem:[%s2028_s1 + $0xb4] ss:$8 sps:$4 sm:$0xff]   ;;  %v1487_v49 = vld [vmem:[%s2028_s1 + $0xb0] ss:$8 sps:$4 sm:$0xff]  }
  0x23   :  { %853 = vmatpush3.bf16.msra.mxu0 %v129_v53  ;;  %2055 = vst [vmem:[#allocation12_spill] sm:$0xff] %v1480_v46  ;;  %2056 = vst [vmem:[#allocation13_spill] sm:$0xff] %v1487_v49  ;;  %v1492_v50 = vld [vmem:[%s2028_s1 + $0xc4] ss:$8 sps:$4 sm:$0xff]   ;;  %v1499_v53 = vld [vmem:[%s2028_s1 + $0xc0] ss:$8 sps:$4 sm:$0xff]  }
  0x24   :  { %854 = vmatprep.subr.bf16.mxu0 %v136_v55  ;;  %2057 = vst [vmem:[#allocation14_spill] sm:$0xff] %v1492_v50  ;;  %2058 = vst [vmem:[#allocation15_spill] sm:$0xff] %v1499_v53  ;;  %v1504_v55 = vld [vmem:[%s2028_s1 + $0xd4] ss:$8 sps:$4 sm:$0xff]  }
  0x25   :  { %2059 = vst [vmem:[#allocation16_spill] sm:$0xff] %v1504_v55 }
  0x27   :  { %855 = vmatpush3.bf16.msra.mxu0 %v128_v57  ;;  %v1511_v57 = vld [vmem:[%s2028_s1 + $0xd0] ss:$8 sps:$4 sm:$0xff]  }
  0x28   :  { %856 = vmatprep.subr.bf16.mxu0 %v135_v59  ;;  %2060 = vst [vmem:[#allocation17_spill] sm:$0xff] %v1511_v57  ;;  %v1516_v59 = vld [vmem:[%s2028_s1 + $0xe4] ss:$8 sps:$4 sm:$0xff]  }
  0x29   :  { %2061 = vst [vmem:[#allocation18_spill] sm:$0xff] %v1516_v59 }
  0x2b   :  { %857 = vmatpush3.bf16.msra.mxu0 %v127_v61  ;;  %v1523_v61 = vld [vmem:[%s2028_s1 + $0xe0] ss:$8 sps:$4 sm:$0xff]  }
  0x2c   :  { %858 = vmatprep.subr.bf16.mxu0 %v134_v63  ;;  %2062 = vst [vmem:[#allocation19_spill] sm:$0xff] %v1523_v61  ;;  %v1528_v63 = vld [vmem:[%s2028_s1 + $0xf4] ss:$8 sps:$4 sm:$0xff]  }
  0x2d   :  { %2063 = vst [vmem:[#allocation20_spill] sm:$0xff] %v1528_v63 }
  0x2f   :  { %859 = vmatpush3.bf16.msra.mxu0 %v126_v1  ;;  %v1535_v1 = vld [vmem:[%s2028_s1 + $0xf0] ss:$8 sps:$4 sm:$0xff]   ;;  %s843_s1 = sld [smem:[#allocation2 + $0x2]] }
  0x30   :  { %2064 = vst [vmem:[#allocation21_spill] sm:$0xff] %v1535_v1 }
  0x32   :  { %335 = vmatmul.mubr.bf16.vlgmr.msra.gmra.mxu0 %v1355_v3 }
  0x33   :  { %342 = vmatprep.mubr.bf16.mxu0 %v1360_v5 }
  0x3a   :  { %343 = vmatmul.mubr.bf16.gmra.mxu0 %v1367_v6 }
  0x3b   :  { %350 = vmatprep.mubr.bf16.mxu0 %v1372_v7 }
  0x42   :  { %351 = vmatmul.mubr.bf16.gmra.mxu0 %v1379_v8 }
  0x43   :  { %358 = vmatprep.mubr.bf16.mxu0 %v1384_v11 }
  0x4a   :  { %359 = vmatmul.mubr.bf16.gmra.mxu0 %v1391_v12 }
  0x4b   :  { %366 = vmatprep.mubr.bf16.mxu0 %v1396_v13 }
  0x52   :  { %367 = vmatmul.mubr.bf16.gmra.mxu0 %v1403_v14 }
  0x53   :  { %374 = vmatprep.mubr.bf16.mxu0 %v1408_v18 }
  0x5a   :  { %375 = vmatmul.mubr.bf16.gmra.mxu0 %v1415_v19 }
  0x5b   :  { %382 = vmatprep.mubr.bf16.mxu0 %v1420_v24 }
  0x62   :  { %383 = vmatmul.mubr.bf16.gmra.mxu0 %v1427_v27 }
  0x63   :  { %390 = vmatprep.mubr.bf16.mxu0 %v1432_v30 }
  0x6a   :  { %391 = vmatmul.mubr.bf16.gmra.mxu0 %v1439_v33 }
  0x6b   :  { %398 = vmatprep.mubr.bf16.mxu0 %v1444_v34 }
  0x72   :  { %399 = vmatmul.mubr.bf16.gmra.mxu0 %v1451_v39 }
  0x73   :  { %406 = vmatprep.mubr.bf16.mxu0 %v1456_v40 }
  0x7a   :  { %407 = vmatmul.mubr.bf16.gmra.mxu0 %v1463_v41 }
  0x7b   :  { %414 = vmatprep.mubr.bf16.mxu0 %v1468_v44 }
  0x82   :  { %415 = vmatmul.mubr.bf16.gmra.mxu0 %v1475_v45 }
  0x83   :  { %422 = vmatprep.mubr.bf16.mxu0 %v1480_v46  ;;  %v95_v46 = vmul.f32 %v1207_v17, %v1348_v0 }
  0x8a   :  { %423 = vmatmul.mubr.bf16.gmra.mxu0 %v1487_v49 }
  0x8b   :  { %430 = vmatprep.mubr.bf16.mxu0 %v1492_v50 }
  0x92   :  { %431 = vmatmul.mubr.bf16.gmra.mxu0 %v1499_v53  ;;  %v94_v53 = vmul.f32 %v1207_v17, %v1343_v62 }
  0x93   :  { %438 = vmatprep.mubr.bf16.mxu0 %v1504_v55  ;;  %v1538_v55 = vstv %s842_s2 }
  0x9a   :  { %439 = vmatmul.mubr.bf16.gmra.mxu0 %v1511_v57 }
  0x9b   :  { %446 = vmatprep.mubr.bf16.mxu0 %v1516_v59 }
  0xa2   :  { %447 = vmatmul.mubr.bf16.gmra.mxu0 %v1523_v61 }
  0xa3   :  { %454 = vmatprep.mubr.bf16.mxu0 %v1528_v63 }
  0xaa   :  { %455 = vmatmul.mubr.bf16.gmra.mxu0 %v1535_v1 }
  0xf2   :  { %v860_v59 = vpop.f32.mrf.mxu0 }
  0xf4   :  { %v861_v57 = vpop.f32.mrf.mxu0 }
  0xf5   :  { %v1542_v50 = vadd.f32 %v861_v57, %v860_v59  ;;  %v96_v59 = vmul.f32 %v1207_v17, %v1331_v58 }
  0xf6   :  { %v863_v61 = vpop.f32.mrf.mxu0 }
  0xf7   :  { %v465_v63 = vmul.f32 %v1542_v50, %v1538_v55 }
  0xf8   :  { %v864_v49 = vpop.f32.mrf.mxu0 }
  0xf9   :  { %v1548_v45 = vadd.f32 %v465_v63, %v94_v53  ;;  %v1550_v1 = vadd.f32 %v864_v49, %v863_v61  ;;  %v97_v61 = vmul.f32 %v1207_v17, %v1336_v60 }
  0xfa   :  { %v866_v44 = vpop.f32.mrf.mxu0 }
  0xfb   :  { %2065 = vst [vmem:[#allocation22_spill] sm:$0xff] %v1548_v45  ;;  %v466_v41 = vmul.f32 %v1550_v1, %v1538_v55 }
  0xfc   :  { %v867_v57 = vpop.f32.mrf.mxu0 }
  0xfd   :  { %v1558_v40 = vadd.f32 %v466_v41, %v95_v46  ;;  %v1560_v39 = vadd.f32 %v867_v57, %v866_v44  ;;  %v98_v46 = vmul.f32 %v1207_v17, %v1319_v54 }
  0xfe   :  { %v869_v0 = vpop.f32.mrf.mxu0 }
  0xff   :  { %2066 = vst [vmem:[#allocation23_spill] sm:$0xff] %v1558_v40  ;;  %v467_v49 = vmul.f32 %v1560_v39, %v1538_v55 }
 0x100   :  { %v870_v53 = vpop.f32.mrf.mxu0 }
 0x101   :  { %v1566_v63 = vadd.f32 %v467_v49, %v96_v59  ;;  %v1568_v45 = vadd.f32 %v870_v53, %v869_v0  ;;  %v99_v49 = vmul.f32 %v1207_v17, %v1324_v56 }
 0x102   :  { %v872_v62 = vpop.f32.mrf.mxu0 }
 0x103   :  { %2067 = vst [vmem:[#allocation24_spill] sm:$0xff] %v1566_v63  ;;  %v468_v58 = vmul.f32 %v1568_v45, %v1538_v55 }
 0x104   :  { %v873_v44 = vpop.f32.mrf.mxu0 }
 0x105   :  { %v1576_v57 = vadd.f32 %v468_v58, %v97_v61  ;;  %v1578_v40 = vadd.f32 %v873_v44, %v872_v62  ;;  %v100_v58 = vmul.f32 %v1207_v17, %v1269_v37 }
 0x106   :  { %v875_v60 = vpop.f32.mrf.mxu0 }
 0x107   :  { %2068 = vst [vmem:[#allocation25_spill] sm:$0xff] %v1576_v57  ;;  %v469_v59 = vmul.f32 %v1578_v40, %v1538_v55 }
 0x108   :  { %v876_v0 = vpop.f32.mrf.mxu0 }
 0x109   :  { %v1584_v53 = vadd.f32 %v469_v59, %v98_v46  ;;  %v1586_v63 = vadd.f32 %v876_v0, %v875_v60  ;;  %v101_v59 = vmul.f32 %v1207_v17, %v1274_v38 }
 0x10a   :  { %v878_v41 = vpop.f32.mrf.mxu0 }
 0x10b   :  { %2069 = vst [vmem:[#allocation26_spill] sm:$0xff] %v1584_v53  ;;  %v470_v54 = vmul.f32 %v1586_v63, %v1538_v55 }
 0x10c   :  { %v879_v61 = vpop.f32.mrf.mxu0 }
 0x10d   :  { %v1594_v44 = vadd.f32 %v470_v54, %v99_v49  ;;  %v1596_v57 = vadd.f32 %v879_v61, %v878_v41  ;;  %v102_v54 = vmul.f32 %v1207_v17, %v1238_v28 }
 0x10e   :  { %v881_v56 = vpop.f32.mrf.mxu0 }
 0x10f   :  { %2070 = vst [vmem:[#allocation27_spill] sm:$0xff] %v1594_v44  ;;  %v471_v46 = vmul.f32 %v1596_v57, %v1538_v55 }
 0x110   :  { %v882_v60 = vpop.f32.mrf.mxu0 }
 0x111   :  { %v1602_v0 = vadd.f32 %v471_v46, %v100_v58  ;;  %v1604_v53 = vadd.f32 %v882_v60, %v881_v56  ;;  %v103_v46 = vmul.f32 %v1207_v17, %v1243_v29 }
 0x112   :  { %v884_v62 = vpop.f32.mrf.mxu0 }
 0x113   :  { %2071 = vst [vmem:[#allocation28_spill] sm:$0xff] %v1602_v0  ;;  %v472_v37 = vmul.f32 %v1604_v53, %v1538_v55 }
 0x114   :  { %v885_v49 = vpop.f32.mrf.mxu0 }
 0x115   :  { %v1612_v61 = vadd.f32 %v472_v37, %v101_v59  ;;  %v1614_v44 = vadd.f32 %v885_v49, %v884_v62  ;;  %v104_v37 = vmul.f32 %v1207_v17, %v1200_v15 }
 0x116   :  { %v887_v38 = vpop.f32.mrf.mxu0 }
 0x117   :  { %2072 = vst [vmem:[#allocation29_spill] sm:$0xff] %v1612_v61  ;;  %v473_v58 = vmul.f32 %v1614_v44, %v1538_v55 }
 0x118   :  { %v888_v56 = vpop.f32.mrf.mxu0 }
 0x119   :  { %v1620_v60 = vadd.f32 %v473_v58, %v102_v54  ;;  %v1622_v0 = vadd.f32 %v888_v56, %v887_v38  ;;  %v105_v58 = vmul.f32 %v1207_v17, %v1205_v16 }
 0x11a   :  { %v890_v41 = vpop.f32.mrf.mxu0 }
 0x11b   :  { %2073 = vst [vmem:[#allocation30_spill] sm:$0xff] %v1620_v60  ;;  %v474_v28 = vmul.f32 %v1622_v0, %v1538_v55 }
 0x11c   :  { %v891_v59 = vpop.f32.mrf.mxu0 }
 0x11d   :  { %v1630_v49 = vadd.f32 %v474_v28, %v103_v46  ;;  %v1632_v61 = vadd.f32 %v891_v59, %v890_v41  ;;  %v106_v28 = vmul.f32 %v1207_v17, %v1182_v9 }
 0x11e   :  { %v893_v29 = vpop.f32.mrf.mxu0 }
 0x11f   :  { %2074 = vst [vmem:[#allocation31_spill] sm:$0xff] %v1630_v49  ;;  %v475_v54 = vmul.f32 %v1632_v61, %v1538_v55 }
 0x120   :  { %v894_v38 = vpop.f32.mrf.mxu0 }
 0x121   :  { %v1638_v56 = vadd.f32 %v475_v54, %v104_v37  ;;  %v1640_v60 = vadd.f32 %v894_v38, %v893_v29  ;;  %v107_v54 = vmul.f32 %v1207_v17, %v1187_v10 }
 0x122   :  { %v896_v62 = vpop.f32.mrf.mxu0 }
 0x123   :  { %2075 = vst [vmem:[#allocation32_spill] sm:$0xff] %v1638_v56  ;;  %v476_v15 = vmul.f32 %v1640_v60, %v1538_v55 }
 0x124   :  { %v897_v46 = vpop.f32.mrf.mxu0 }
 0x125   :  { %v1648_v59 = vadd.f32 %v476_v15, %v105_v58  ;;  %v1650_v49 = vadd.f32 %v897_v46, %v896_v62  ;;  %v108_v15 = vmul.f32 %v1207_v17, %v1164_v2 }
 0x126   :  { %v899_v16 = vpop.f32.mrf.mxu0 }
 0x127   :  { %2076 = vst [vmem:[#allocation33_spill] sm:$0xff] %v1648_v59  ;;  %v477_v37 = vmul.f32 %v1650_v49, %v1538_v55 }
 0x128   :  { %v900_v29 = vpop.f32.mrf.mxu0 }
 0x129   :  { %v1656_v38 = vadd.f32 %v477_v37, %v106_v28  ;;  %v1658_v56 = vadd.f32 %v900_v29, %v899_v16  ;;  %v109_v37 = vmul.f32 %v1207_v17, %v1169_v4 }
 0x12a   :  { %v902_v41 = vpop.f32.mrf.mxu0 }
 0x12b   :  { %2077 = vst [vmem:[#allocation34_spill] sm:$0xff] %v1656_v38  ;;  %v478_v9 = vmul.f32 %v1658_v56, %v1538_v55 }
 0x12c   :  { %v903_v58 = vpop.f32.mrf.mxu0 }
 0x12d   :  { %v1666_v46 = vadd.f32 %v478_v9, %v107_v54  ;;  %v1668_v59 = vadd.f32 %v903_v58, %v902_v41 }
 0x12e   :  { %v905_v10 = vpop.f32.mrf.mxu0 }
 0x12f   :  { %2078 = vst [vmem:[#allocation35_spill] sm:$0xff] %v1666_v46  ;;  %v479_v28 = vmul.f32 %v1668_v59, %v1538_v55 }
 0x130   :  { %v906_v16 = vpop.f32.mrf.mxu0 }
 0x131   :  { %v1674_v29 = vadd.f32 %v479_v28, %v108_v15  ;;  %v1676_v38 = vadd.f32 %v906_v16, %v905_v10 }
 0x132   :  { %v908_v62 = vpop.f32.mrf.mxu0 }
 0x133   :  { %2079 = vst [vmem:[#allocation36_spill] sm:$0xff] %v1674_v29  ;;  %v480_v2 = vmul.f32 %v1676_v38, %v1538_v55 }
 0x134   :  { %v909_v54 = vpop.f32.mrf.mxu0 }
 0x135   :  { %v1682_v9 = vadd.f32 %v480_v2, %v109_v37  ;;  %v1684_v58 = vadd.f32 %v909_v54, %v908_v62 }
 0x136   :  { %v911_v46 = vpop.f32.mrf.mxu0 }
 0x137   :  { %2080 = vst [vmem:[#allocation37_spill] sm:$0xff] %v1682_v9  ;;  %v481_v4 = vmul.f32 %v1684_v58, %v1538_v55 }
 0x138   :  { %v912_v17 = vpop.f32.mrf.mxu0 }
 0x139   :  { %v1689_v15 = vadd.f32 %v481_v4, %v1309_v51  ;;  %v1691_v10 = vadd.f32 %v912_v17, %v911_v46 }
 0x13a   :  { %v914_v28 = vpop.f32.mrf.mxu0 }
 0x13b   :  { %2081 = vst [vmem:[#allocation38_spill] sm:$0xff] %v1689_v15  ;;  %v482_v16 = vmul.f32 %v1691_v10, %v1538_v55 }
 0x13c   :  { %v915_v2 = vpop.f32.mrf.mxu0 }
 0x13d   :  { %v1698_v62 = vadd.f32 %v482_v16, %v1312_v52  ;;  %v1700_v54 = vadd.f32 %v915_v2, %v914_v28 }
 0x13e   :  { %v917_v41 = vpop.f32.mrf.mxu0 }
 0x13f   :  { %2082 = vst [vmem:[#allocation39_spill] sm:$0xff] %v1698_v62  ;;  %v483_v51 = vmul.f32 %v1700_v54, %v1538_v55 }
 0x140   :  { %v918_v4 = vpop.f32.mrf.mxu0 }
 0x141   :  { %v1705_v46 = vadd.f32 %v483_v51, %v1297_v47  ;;  %v1707_v17 = vadd.f32 %v918_v4, %v917_v41 }
 0x142   :  { %v920_v15 = vpop.f32.mrf.mxu0 }
 0x143   :  { %2083 = vst [vmem:[#allocation40_spill] sm:$0xff] %v1705_v46  ;;  %v484_v37 = vmul.f32 %v1707_v17, %v1538_v55 }
 0x144   :  { %v921_v16 = vpop.f32.mrf.mxu0 }
 0x145   :  { %v1714_v28 = vadd.f32 %v484_v37, %v1300_v48  ;;  %v1716_v2 = vadd.f32 %v921_v16, %v920_v15 }
 0x146   :  { %v923_v62 = vpop.f32.mrf.mxu0 }
 0x147   :  { %2084 = vst [vmem:[#allocation41_spill] sm:$0xff] %v1714_v28  ;;  %v485_v47 = vmul.f32 %v1716_v2, %v1538_v55 }
 0x148   :  { %v924_v51 = vpop.f32.mrf.mxu0 }
 0x149   :  { %v1721_v41 = vadd.f32 %v485_v47, %v1285_v42  ;;  %v1723_v4 = vadd.f32 %v924_v51, %v923_v62 }
 0x14a   :  { %v926_v46 = vpop.f32.mrf.mxu0 }
 0x14b   :  { %2085 = vst [vmem:[#allocation42_spill] sm:$0xff] %v1721_v41  ;;  %v486_v52 = vmul.f32 %v1723_v4, %v1538_v55 }
 0x14c   :  { %v927_v9 = vpop.f32.mrf.mxu0 }
 0x14d   :  { %v1728_v48 = vadd.f32 %v486_v52, %v1288_v43  ;;  %v928_v15 = vadd.f32 %v927_v9, %v926_v46 }
 0x14e   :  { %v929_v37 = vpop.f32.mrf.mxu0 }
 0x14f   :  { %2086 = vst [vmem:[#allocation43_spill] sm:$0xff] %v1728_v48  ;;  %v487_v16 = vmul.f32 %v928_v15, %v1538_v55 }
 0x150   :  { %v930_v28 = vpop.f32.mrf.mxu0 }
 0x151   :  { %v1732_v29 = vadd.f32 %v487_v16, %v1261_v35  ;;  %v931_v42 = vadd.f32 %v930_v28, %v929_v37 }
 0x152   :  { %v932_v47 = vpop.f32.mrf.mxu0 }
 0x153   :  { %2087 = vst [vmem:[#allocation44_spill] sm:$0xff] %v1732_v29  ;;  %v488_v62 = vmul.f32 %v931_v42, %v1538_v55 }
 0x154   :  { %v933_v51 = vpop.f32.mrf.mxu0 }
 0x155   :  { %v1736_v41 = vadd.f32 %v488_v62, %v1264_v36  ;;  %v934_v34 = vadd.f32 %v933_v51, %v932_v47 }
 0x156   :  { %v935_v33 = vpop.f32.mrf.mxu0 }
 0x157   :  { %2088 = vst [vmem:[#allocation45_spill] sm:$0xff] %v1736_v41  ;;  %v489_v43 = vmul.f32 %v934_v34, %v1538_v55 }
 0x158   :  { %v936_v9 = vpop.f32.mrf.mxu0 }
 0x159   :  { %v1740_v46 = vadd.f32 %v489_v43, %v1249_v31  ;;  %v937_v52 = vadd.f32 %v936_v9, %v935_v33 }
 0x15a   :  { %v938_v48 = vpop.f32.mrf.mxu0 }
 0x15b   :  { %2089 = vst [vmem:[#allocation46_spill] sm:$0xff] %v1740_v46  ;;  %v490_v35 = vmul.f32 %v937_v52, %v1538_v55 }
 0x15c   :  { %v939_v28 = vpop.f32.mrf.mxu0 }
 0x15d   :  { %v1744_v37 = vadd.f32 %v490_v35, %v1252_v32  ;;  %v940_v16 = vadd.f32 %v939_v28, %v938_v48 }
 0x15e   :  { %v941_v29 = vpop.f32.mrf.mxu0 }
 0x15f   :  { %2090 = vst [vmem:[#allocation47_spill] sm:$0xff] %v1744_v37  ;;  %v491_v36 = vmul.f32 %v940_v16, %v1538_v55 }
 0x160   :  { %v942_v47 = vpop.f32.mrf.mxu0 }
 0x161   :  { %v1748_v62 = vadd.f32 %v491_v36, %v1230_v25  ;;  %v943_v51 = vadd.f32 %v942_v47, %v941_v29 }
 0x162   :  { %v944_v41 = vpop.f32.mrf.mxu0 }
 0x163   :  { %2091 = vst [vmem:[#allocation48_spill] sm:$0xff] %v1748_v62  ;;  %v492_v31 = vmul.f32 %v943_v51, %v1538_v55 }
 0x164   :  { %v945_v33 = vpop.f32.mrf.mxu0 }
 0x165   :  { %v1752_v43 = vadd.f32 %v492_v31, %v1233_v26  ;;  %v946_v9 = vadd.f32 %v945_v33, %v944_v41 }
 0x166   :  { %v947_v46 = vpop.f32.mrf.mxu0 }
 0x167   :  { %v493_v32 = vmul.f32 %v946_v9, %v1538_v55 }
 0x168   :  { %v948_v48 = vpop.f32.mrf.mxu0 }
 0x169   :  { %v1756_v35 = vadd.f32 %v493_v32, %v1222_v22  ;;  %v949_v28 = vadd.f32 %v948_v48, %v947_v46 }
 0x16a   :  { %v950_v37 = vpop.f32.mrf.mxu0 }
 0x16b   :  { %v494_v25 = vmul.f32 %v949_v28, %v1538_v55  ;;  %v543_v46 = vpack.c.bf16 %v949_v28, %v946_v9  ;;  %v2121_v28 = vld [vmem:[#allocation24_spill] sm:$0xff] }
 0x16c   :  { %v951_v29 = vpop.f32.mrf.mxu0 }
 0x16d   :  { %v1760_v36 = vadd.f32 %v494_v25, %v1225_v23  ;;  %v952_v47 = vadd.f32 %v951_v29, %v950_v37  ;;  %v2092_v23 = vpack.c.bf16 %v1676_v38, %v1668_v59  ;;  %v542_v37 = vpack.c.bf16 %v943_v51, %v940_v16 }
 0x16e   :  { %v953_v62 = vpop.f32.mrf.mxu0  ;;  %v2093_v25 = vpack.c.bf16 %v1658_v56, %v1650_v49  ;;  %v539_v59 = vpack.c.bf16 %v1723_v4, %v1716_v2  ;;  %v2096_v49 = vpack.c.bf16 %v1604_v53, %v1596_v57  ;;  %v2101_v57 = vpack.c.bf16 %v1550_v1, %v1542_v50 }
 0x16f   :  { %v495_v26 = vmul.f32 %v952_v47, %v1538_v55 }
 0x170   :  { %v954_v41 = vpop.f32.mrf.mxu0 }
 0x171   :  { %v1764_v31 = vadd.f32 %v495_v26, %v1216_v20  ;;  %v955_v33 = vadd.f32 %v954_v41, %v953_v62  ;;  %v541_v20 = vpack.c.bf16 %v937_v52, %v934_v34  ;;  %v2095_v62 = vpack.c.bf16 %v1622_v0, %v1614_v44 }
 0x172   :  { %v2097_v34 = vpack.c.bf16 %v1586_v63, %v1578_v40  ;;  %v2099_v44 = vpack.c.bf16 %v1568_v45, %v1560_v39  ;;  %v2100_v0 = vpack.c.bf16 %v1691_v10, %v1684_v58  ;;  %v2116_v39 = vld [vmem:[#allocation19_spill] sm:$0xff]  ;;  %v2117_v40 = vld [vmem:[#allocation20_spill] sm:$0xff]  ;;  %v2118_v45 = vld [vmem:[#allocation21_spill] sm:$0xff]  ;;  %v1833_v63 = vstv %s843_s1 }
 0x173   :  { %v496_v22 = vmul.f32 %v955_v33, %v1538_v55  ;;  %v544_v32 = vpack.c.bf16 %v955_v33, %v952_v47  ;;  %v2094_v55 = vpack.c.bf16 %v1640_v60, %v1632_v61  ;;  %v2098_v61 = vpack.c.bf16 %v1707_v17, %v1700_v54  ;;  %v2119_v58 = vld [vmem:[#allocation22_spill] sm:$0xff] }
 0x175   :  { %v1768_v48 = vadd.f32 %v496_v22, %v1219_v21  ;;  %956 = vmatprep.subr.bf16.mxu1 %v544_v32  ;;  %v540_v21 = vpack.c.bf16 %v931_v42, %v928_v15  ;;  %v2120_v15 = vld [vmem:[#allocation23_spill] sm:$0xff]  ;;  %v2122_v22 = vld [vmem:[#allocation25_spill] sm:$0xff] }
 0x176   :  { %957 = vmatpush3.bf16.msra.mxu1 %v2092_v23 }
 0x177   :  { %958 = vmatprep.subr.bf16.mxu1 %v543_v46 }
 0x17a   :  { %959 = vmatpush3.bf16.msra.mxu1 %v2093_v25 }
 0x17b   :  { %960 = vmatprep.subr.bf16.mxu1 %v542_v37 }
 0x17e   :  { %961 = vmatpush3.bf16.msra.mxu1 %v2094_v55 }
 0x17f   :  { %962 = vmatprep.subr.bf16.mxu1 %v541_v20  ;;  %v2123_v20 = vld [vmem:[#allocation26_spill] sm:$0xff] }
 0x182   :  { %963 = vmatpush3.bf16.msra.mxu1 %v2095_v62 }
 0x183   :  { %964 = vmatprep.subr.bf16.mxu1 %v540_v21 }
 0x186   :  { %965 = vmatpush3.bf16.msra.mxu1 %v2096_v49 }
 0x187   :  { %966 = vmatprep.subr.bf16.mxu1 %v539_v59 }
 0x18a   :  { %967 = vmatpush3.bf16.msra.mxu1 %v2097_v34  ;;  %v2124_v34 = vld [vmem:[#allocation27_spill] sm:$0xff] }
 0x18b   :  { %968 = vmatprep.subr.bf16.mxu1 %v2098_v61 }
 0x18e   :  { %969 = vmatpush3.bf16.msra.mxu1 %v2099_v44 }
 0x18f   :  { %970 = vmatprep.subr.bf16.mxu1 %v2100_v0 }
 0x192   :  { %971 = vmatpush3.bf16.msra.mxu1 %v2101_v57 }
 0x195   :  { %578 = vmatmul.mubr.bf16.vlgmr.msra.gmra.mxu1 %v1355_v3  ;;  %v2102_v3 = vld [vmem:[#allocation5_spill] sm:$0xff] }
 0x196   :  { %585 = vmatprep.mubr.bf16.mxu1 %v1360_v5  ;;  %v2103_v5 = vld [vmem:[#allocation6_spill] sm:$0xff] }
 0x19d   :  { %586 = vmatmul.mubr.bf16.gmra.mxu1 %v1367_v6  ;;  %v2104_v6 = vld [vmem:[#allocation7_spill] sm:$0xff] }
 0x19e   :  { %593 = vmatprep.mubr.bf16.mxu1 %v1372_v7  ;;  %v2105_v7 = vld [vmem:[#allocation8_spill] sm:$0xff] }
 0x1a5   :  { %594 = vmatmul.mubr.bf16.gmra.mxu1 %v1379_v8  ;;  %v2106_v8 = vld [vmem:[#allocation9_spill] sm:$0xff] }
 0x1a6   :  { %601 = vmatprep.mubr.bf16.mxu1 %v1384_v11  ;;  %v2107_v11 = vld [vmem:[#allocation10_spill] sm:$0xff] }
 0x1ad   :  { %602 = vmatmul.mubr.bf16.gmra.mxu1 %v1391_v12  ;;  %v2108_v12 = vld [vmem:[#allocation11_spill] sm:$0xff] }
 0x1ae   :  { %609 = vmatprep.mubr.bf16.mxu1 %v1396_v13  ;;  %v2109_v13 = vld [vmem:[#allocation12_spill] sm:$0xff] }
 0x1b5   :  { %610 = vmatmul.mubr.bf16.gmra.mxu1 %v1403_v14  ;;  %v2110_v14 = vld [vmem:[#allocation13_spill] sm:$0xff] }
 0x1b6   :  { %617 = vmatprep.mubr.bf16.mxu1 %v1408_v18  ;;  %v2111_v18 = vld [vmem:[#allocation14_spill] sm:$0xff] }
 0x1bd   :  { %618 = vmatmul.mubr.bf16.gmra.mxu1 %v1415_v19  ;;  %v2112_v19 = vld [vmem:[#allocation15_spill] sm:$0xff] }
 0x1be   :  { %625 = vmatprep.mubr.bf16.mxu1 %v1420_v24  ;;  %v2113_v24 = vld [vmem:[#allocation16_spill] sm:$0xff] }
 0x1c5   :  { %626 = vmatmul.mubr.bf16.gmra.mxu1 %v1427_v27  ;;  %v2114_v27 = vld [vmem:[#allocation17_spill] sm:$0xff] }
 0x1c6   :  { %633 = vmatprep.mubr.bf16.mxu1 %v1432_v30  ;;  %v2115_v30 = vld [vmem:[#allocation18_spill] sm:$0xff] }
 0x1cd   :  { %634 = vmatmul.mubr.bf16.gmra.mxu1 %v2102_v3 }
 0x1ce   :  { %641 = vmatprep.mubr.bf16.mxu1 %v2103_v5  ;;  %v2125_v5 = vld [vmem:[#allocation28_spill] sm:$0xff] }
 0x1d5   :  { %642 = vmatmul.mubr.bf16.gmra.mxu1 %v2104_v6 }
 0x1d6   :  { %649 = vmatprep.mubr.bf16.mxu1 %v2105_v7 }
 0x1dd   :  { %650 = vmatmul.mubr.bf16.gmra.mxu1 %v2106_v8 }
 0x1de   :  { %657 = vmatprep.mubr.bf16.mxu1 %v2107_v11 }
 0x1e5   :  { %658 = vmatmul.mubr.bf16.gmra.mxu1 %v2108_v12 }
 0x1e6   :  { %665 = vmatprep.mubr.bf16.mxu1 %v2109_v13  ;;  %v2126_v13 = vld [vmem:[#allocation29_spill] sm:$0xff] }
 0x1ed   :  { %666 = vmatmul.mubr.bf16.gmra.mxu1 %v2110_v14 }
 0x1ee   :  { %673 = vmatprep.mubr.bf16.mxu1 %v2111_v18 }
 0x1f5   :  { %674 = vmatmul.mubr.bf16.gmra.mxu1 %v2112_v19 }
 0x1f6   :  { %681 = vmatprep.mubr.bf16.mxu1 %v2113_v24 }
 0x1fd   :  { %682 = vmatmul.mubr.bf16.gmra.mxu1 %v2114_v27 }
 0x1fe   :  { %689 = vmatprep.mubr.bf16.mxu1 %v2115_v30  ;;  %v2127_v30 = vld [vmem:[#allocation30_spill] sm:$0xff] }
 0x205   :  { %690 = vmatmul.mubr.bf16.gmra.mxu1 %v2116_v39 }
 0x206   :  { %697 = vmatprep.mubr.bf16.mxu1 %v2117_v40 }
 0x20d   :  { %698 = vmatmul.mubr.bf16.gmra.mxu1 %v2118_v45 }
 0x255   :  { %v972_v50 = vpop.f32.mrf.mxu1 }
 0x257   :  { %v973_v1 = vpop.f32.mrf.mxu1 }
 0x258   :  { %v974_v53 = vadd.f32 %v973_v1, %v972_v50 }
 0x259   :  { %v975_v60 = vpop.f32.mrf.mxu1 }
 0x25a   :  { %v708_v56 = vmul.f32 %v974_v53, %v1833_v63  ;;  %v2128_v53 = vld [vmem:[#allocation31_spill] sm:$0xff] }
 0x25b   :  { %v976_v38 = vpop.f32.mrf.mxu1 }
 0x25c   :  { %v740_v10 = vadd.f32 %v708_v56, %v2119_v58  ;;  %v977_v54 = vadd.f32 %v976_v38, %v975_v60 }
 0x25d   :  { %v978_v17 = vpop.f32.mrf.mxu1 }
 0x25e   :  { %773 = vst.msk [vmem:[%s2030_s3] sm:$0xff] %vm772_vm0, %v740_v10  ;;  %v709_v2 = vmul.f32 %v977_v54, %v1833_v63  ;;  %v2129_v54 = vld [vmem:[#allocation32_spill] sm:$0xff] }
 0x25f   :  { %v979_v4 = vpop.f32.mrf.mxu1 }
 0x260   :  { %v741_v42 = vadd.f32 %v709_v2, %v2120_v15  ;;  %v980_v52 = vadd.f32 %v979_v4, %v978_v17 }
 0x261   :  { %v981_v16 = vpop.f32.mrf.mxu1 }
 0x262   :  { %774 = vst.msk [vmem:[%s2030_s3 + $0x8] sm:$0xff] %vm772_vm0, %v741_v42  ;;  %v710_v51 = vmul.f32 %v980_v52, %v1833_v63  ;;  %v2130_v52 = vld [vmem:[#allocation33_spill] sm:$0xff] }
 0x263   :  { %v982_v9 = vpop.f32.mrf.mxu1 }
 0x264   :  { %v742_v29 = vadd.f32 %v710_v51, %v2121_v28  ;;  %v983_v47 = vadd.f32 %v982_v9, %v981_v16 }
 0x265   :  { %v984_v26 = vpop.f32.mrf.mxu1 }
 0x266   :  { %775 = vst.msk [vmem:[%s2030_s3 + $0x10] sm:$0xff] %vm772_vm0, %v742_v29  ;;  %v711_v41 = vmul.f32 %v983_v47, %v1833_v63  ;;  %v2131_v47 = vld [vmem:[#allocation34_spill] sm:$0xff] }
 0x267   :  { %v985_v33 = vpop.f32.mrf.mxu1 }
 0x268   :  { %v743_v32 = vadd.f32 %v711_v41, %v2122_v22  ;;  %v986_v46 = vadd.f32 %v985_v33, %v984_v26 }
 0x269   :  { %v987_v23 = vpop.f32.mrf.mxu1 }
 0x26a   :  { %776 = vst.msk [vmem:[%s2030_s3 + $0x18] sm:$0xff] %vm772_vm0, %v743_v32  ;;  %v712_v37 = vmul.f32 %v986_v46, %v1833_v63  ;;  %v2132_v46 = vld [vmem:[#allocation35_spill] sm:$0xff] }
 0x26b   :  { %v988_v25 = vpop.f32.mrf.mxu1 }
 0x26c   :  { %v744_v55 = vadd.f32 %v712_v37, %v2123_v20  ;;  %v989_v21 = vadd.f32 %v988_v25, %v987_v23 }
 0x26d   :  { %v990_v62 = vpop.f32.mrf.mxu1 }
 0x26e   :  { %777 = vst.msk [vmem:[%s2030_s3 + $0x20] sm:$0xff] %vm772_vm0, %v744_v55  ;;  %v713_v59 = vmul.f32 %v989_v21, %v1833_v63  ;;  %v2133_v21 = vld [vmem:[#allocation36_spill] sm:$0xff] }
 0x26f   :  { %v991_v49 = vpop.f32.mrf.mxu1 }
 0x270   :  { %v745_v61 = vadd.f32 %v713_v59, %v2124_v34  ;;  %v992_v44 = vadd.f32 %v991_v49, %v990_v62 }
 0x271   :  { %v993_v0 = vpop.f32.mrf.mxu1 }
 0x272   :  { %778 = vst.msk [vmem:[%s2030_s3 + $0x28] sm:$0xff] %vm772_vm0, %v745_v61  ;;  %v714_v57 = vmul.f32 %v992_v44, %v1833_v63  ;;  %v2134_v44 = vld [vmem:[#allocation37_spill] sm:$0xff] }
 0x273   :  { %v994_v3 = vpop.f32.mrf.mxu1 }
 0x274   :  { %v746_v6 = vadd.f32 %v714_v57, %v2125_v5  ;;  %v995_v7 = vadd.f32 %v994_v3, %v993_v0 }
 0x275   :  { %v996_v8 = vpop.f32.mrf.mxu1 }
 0x276   :  { %779 = vst.msk [vmem:[%s2030_s3 + $0x30] sm:$0xff] %vm772_vm0, %v746_v6  ;;  %v715_v11 = vmul.f32 %v995_v7, %v1833_v63  ;;  %v2135_v7 = vld [vmem:[#allocation38_spill] sm:$0xff] }
 0x277   :  { %v997_v12 = vpop.f32.mrf.mxu1 }
 0x278   :  { %v747_v14 = vadd.f32 %v715_v11, %v2126_v13  ;;  %v998_v18 = vadd.f32 %v997_v12, %v996_v8 }
 0x279   :  { %v999_v19 = vpop.f32.mrf.mxu1 }
 0x27a   :  { %780 = vst.msk [vmem:[%s2030_s3 + $0x38] sm:$0xff] %vm772_vm0, %v747_v14  ;;  %v716_v24 = vmul.f32 %v998_v18, %v1833_v63  ;;  %v2136_v18 = vld [vmem:[#allocation39_spill] sm:$0xff] }
 0x27b   :  { %v1000_v27 = vpop.f32.mrf.mxu1 }
 0x27c   :  { %v748_v39 = vadd.f32 %v716_v24, %v2127_v30  ;;  %v1001_v40 = vadd.f32 %v1000_v27, %v999_v19 }
 0x27d   :  { %v1002_v45 = vpop.f32.mrf.mxu1 }
 0x27e   :  { %781 = vst.msk [vmem:[%s2030_s3 + $0x40] sm:$0xff] %vm772_vm0, %v748_v39  ;;  %v717_v50 = vmul.f32 %v1001_v40, %v1833_v63  ;;  %v2137_v40 = vld [vmem:[#allocation40_spill] sm:$0xff] }
 0x27f   :  { %v1003_v1 = vpop.f32.mrf.mxu1 }
 0x280   :  { %v749_v60 = vadd.f32 %v717_v50, %v2128_v53  ;;  %v1004_v56 = vadd.f32 %v1003_v1, %v1002_v45 }
 0x281   :  { %v1005_v38 = vpop.f32.mrf.mxu1 }
 0x282   :  { %782 = vst.msk [vmem:[%s2030_s3 + $0x48] sm:$0xff] %vm772_vm0, %v749_v60  ;;  %v718_v58 = vmul.f32 %v1004_v56, %v1833_v63  ;;  %v2138_v56 = vld [vmem:[#allocation41_spill] sm:$0xff] }
 0x283   :  { %v1006_v10 = vpop.f32.mrf.mxu1 }
 0x284   :  { %v750_v17 = vadd.f32 %v718_v58, %v2129_v54  ;;  %v1007_v2 = vadd.f32 %v1006_v10, %v1005_v38 }
 0x285   :  { %v1008_v4 = vpop.f32.mrf.mxu1 }
 0x286   :  { %783 = vst.msk [vmem:[%s2030_s3 + $0x50] sm:$0xff] %vm772_vm0, %v750_v17  ;;  %v719_v15 = vmul.f32 %v1007_v2, %v1833_v63  ;;  %v2139_v2 = vld [vmem:[#allocation42_spill] sm:$0xff] }
 0x287   :  { %v1009_v42 = vpop.f32.mrf.mxu1 }
 0x288   :  { %v751_v16 = vadd.f32 %v719_v15, %v2130_v52  ;;  %v1010_v51 = vadd.f32 %v1009_v42, %v1008_v4 }
 0x289   :  { %v1011_v9 = vpop.f32.mrf.mxu1 }
 0x28a   :  { %784 = vst.msk [vmem:[%s2030_s3 + $0x58] sm:$0xff] %vm772_vm0, %v751_v16  ;;  %v720_v28 = vmul.f32 %v1010_v51, %v1833_v63  ;;  %v2140_v51 = vld [vmem:[#allocation43_spill] sm:$0xff] }
 0x28b   :  { %v1012_v29 = vpop.f32.mrf.mxu1 }
 0x28c   :  { %v752_v26 = vadd.f32 %v720_v28, %v2131_v47  ;;  %v1013_v41 = vadd.f32 %v1012_v29, %v1011_v9 }
 0x28d   :  { %v1014_v33 = vpop.f32.mrf.mxu1 }
 0x28e   :  { %785 = vst.msk [vmem:[%s2030_s3 + $0x60] sm:$0xff] %vm772_vm0, %v752_v26  ;;  %v721_v22 = vmul.f32 %v1013_v41, %v1833_v63  ;;  %v2141_v41 = vld [vmem:[#allocation44_spill] sm:$0xff] }
 0x28f   :  { %v1015_v32 = vpop.f32.mrf.mxu1 }
 0x290   :  { %v753_v23 = vadd.f32 %v721_v22, %v2132_v46  ;;  %v1016_v37 = vadd.f32 %v1015_v32, %v1014_v33 }
 0x291   :  { %v1017_v25 = vpop.f32.mrf.mxu1 }
 0x292   :  { %786 = vst.msk [vmem:[%s2030_s3 + $0x68] sm:$0xff] %vm772_vm0, %v753_v23  ;;  %v722_v20 = vmul.f32 %v1016_v37, %v1833_v63  ;;  %v2142_v37 = vld [vmem:[#allocation45_spill] sm:$0xff] }
 0x293   :  { %v1018_v55 = vpop.f32.mrf.mxu1 }
 0x294   :  { %v754_v62 = vadd.f32 %v722_v20, %v2133_v21  ;;  %v1019_v59 = vadd.f32 %v1018_v55, %v1017_v25 }
 0x295   :  { %v1020_v49 = vpop.f32.mrf.mxu1 }
 0x296   :  { %787 = vst.msk [vmem:[%s2030_s3 + $0x70] sm:$0xff] %vm772_vm0, %v754_v62  ;;  %v723_v34 = vmul.f32 %v1019_v59, %v1833_v63  ;;  %v2143_v59 = vld [vmem:[#allocation46_spill] sm:$0xff] }
 0x297   :  { %v1021_v61 = vpop.f32.mrf.mxu1 }
 0x298   :  { %v755_v0 = vadd.f32 %v723_v34, %v2134_v44  ;;  %v1022_v57 = vadd.f32 %v1021_v61, %v1020_v49 }
 0x299   :  { %v1023_v3 = vpop.f32.mrf.mxu1 }
 0x29a   :  { %788 = vst.msk [vmem:[%s2030_s3 + $0x78] sm:$0xff] %vm772_vm0, %v755_v0  ;;  %v724_v5 = vmul.f32 %v1022_v57, %v1833_v63  ;;  %v2144_v57 = vld [vmem:[#allocation47_spill] sm:$0xff] }
 0x29b   :  { %v1024_v6 = vpop.f32.mrf.mxu1 }
 0x29c   :  { %v756_v8 = vadd.f32 %v724_v5, %v2135_v7  ;;  %v1025_v11 = vadd.f32 %v1024_v6, %v1023_v3 }
 0x29d   :  { %v1026_v12 = vpop.f32.mrf.mxu1 }
 0x29e   :  { %789 = vst.msk [vmem:[%s2030_s3 + $0x80] sm:$0xff] %vm772_vm0, %v756_v8  ;;  %v725_v13 = vmul.f32 %v1025_v11, %v1833_v63  ;;  %v2145_v11 = vld [vmem:[#allocation48_spill] sm:$0xff] }
 0x29f   :  { %v1027_v14 = vpop.f32.mrf.mxu1 }
 0x2a0   :  { %v757_v19 = vadd.f32 %v725_v13, %v2136_v18  ;;  %v1028_v24 = vadd.f32 %v1027_v14, %v1026_v12 }
 0x2a1   :  { %v1029_v27 = vpop.f32.mrf.mxu1 }
 0x2a2   :  { %790 = vst.msk [vmem:[%s2030_s3 + $0x88] sm:$0xff] %vm772_vm0, %v757_v19  ;;  %v726_v30 = vmul.f32 %v1028_v24, %v1833_v63 }
 0x2a3   :  { %v1030_v39 = vpop.f32.mrf.mxu1 }
 0x2a4   :  { %v758_v45 = vadd.f32 %v726_v30, %v2137_v40  ;;  %v1031_v50 = vadd.f32 %v1030_v39, %v1029_v27 }
 0x2a5   :  { %v1032_v1 = vpop.f32.mrf.mxu1 }
 0x2a6   :  { %791 = vst.msk [vmem:[%s2030_s3 + $0x90] sm:$0xff] %vm772_vm0, %v758_v45  ;;  %v727_v53 = vmul.f32 %v1031_v50, %v1833_v63 }
 0x2a7   :  { %v1033_v60 = vpop.f32.mrf.mxu1 }
 0x2a8   :  { %v759_v38 = vadd.f32 %v727_v53, %v2138_v56  ;;  %v1034_v58 = vadd.f32 %v1033_v60, %v1032_v1 }
 0x2a9   :  { %v1035_v10 = vpop.f32.mrf.mxu1 }
 0x2aa   :  { %792 = vst.msk [vmem:[%s2030_s3 + $0x98] sm:$0xff] %vm772_vm0, %v759_v38  ;;  %v728_v54 = vmul.f32 %v1034_v58, %v1833_v63 }
 0x2ab   :  { %v1036_v17 = vpop.f32.mrf.mxu1 }
 0x2ac   :  { %v760_v4 = vadd.f32 %v728_v54, %v2139_v2  ;;  %v1037_v15 = vadd.f32 %v1036_v17, %v1035_v10 }
 0x2ad   :  { %v1038_v42 = vpop.f32.mrf.mxu1 }
 0x2ae   :  { %793 = vst.msk [vmem:[%s2030_s3 + $0xa0] sm:$0xff] %vm772_vm0, %v760_v4  ;;  %v729_v52 = vmul.f32 %v1037_v15, %v1833_v63 }
 0x2af   :  { %v1039_v16 = vpop.f32.mrf.mxu1 }
 0x2b0   :  { %v761_v9 = vadd.f32 %v729_v52, %v2140_v51  ;;  %v1040_v28 = vadd.f32 %v1039_v16, %v1038_v42 }
 0x2b1   :  { %v1041_v29 = vpop.f32.mrf.mxu1 }
 0x2b2   :  { %794 = vst.msk [vmem:[%s2030_s3 + $0xa8] sm:$0xff] %vm772_vm0, %v761_v9  ;;  %v730_v47 = vmul.f32 %v1040_v28, %v1833_v63 }
 0x2b3   :  { %v1042_v26 = vpop.f32.mrf.mxu1 }
 0x2b4   :  { %v762_v33 = vadd.f32 %v730_v47, %v2141_v41  ;;  %v1043_v22 = vadd.f32 %v1042_v26, %v1041_v29 }
 0x2b5   :  { %v1044_v32 = vpop.f32.mrf.mxu1 }
 0x2b6   :  { %795 = vst.msk [vmem:[%s2030_s3 + $0xb0] sm:$0xff] %vm772_vm0, %v762_v33  ;;  %v731_v46 = vmul.f32 %v1043_v22, %v1833_v63 }
 0x2b7   :  { %v1045_v23 = vpop.f32.mrf.mxu1 }
 0x2b8   :  { %v763_v25 = vadd.f32 %v731_v46, %v2142_v37  ;;  %v1046_v20 = vadd.f32 %v1045_v23, %v1044_v32 }
 0x2b9   :  { %v1047_v55 = vpop.f32.mrf.mxu1 }
 0x2ba   :  { %796 = vst.msk [vmem:[%s2030_s3 + $0xb8] sm:$0xff] %vm772_vm0, %v763_v25  ;;  %v732_v21 = vmul.f32 %v1046_v20, %v1833_v63 }
 0x2bb   :  { %v1048_v62 = vpop.f32.mrf.mxu1 }
 0x2bc   :  { %v764_v49 = vadd.f32 %v732_v21, %v2143_v59  ;;  %v1049_v34 = vadd.f32 %v1048_v62, %v1047_v55 }
 0x2bd   :  { %v1050_v61 = vpop.f32.mrf.mxu1 }
 0x2be   :  { %797 = vst.msk [vmem:[%s2030_s3 + $0xc0] sm:$0xff] %vm772_vm0, %v764_v49  ;;  %v733_v44 = vmul.f32 %v1049_v34, %v1833_v63 }
 0x2bf   :  { %v1051_v0 = vpop.f32.mrf.mxu1 }
 0x2c0   :  { %v765_v3 = vadd.f32 %v733_v44, %v2144_v57  ;;  %v1052_v5 = vadd.f32 %v1051_v0, %v1050_v61 }
 0x2c1   :  { %v1053_v6 = vpop.f32.mrf.mxu1 }
 0x2c2   :  { %798 = vst.msk [vmem:[%s2030_s3 + $0xc8] sm:$0xff] %vm772_vm0, %v765_v3  ;;  %v734_v7 = vmul.f32 %v1052_v5, %v1833_v63 }
 0x2c3   :  { %v1054_v8 = vpop.f32.mrf.mxu1 }
 0x2c4   :  { %v766_v12 = vadd.f32 %v734_v7, %v2145_v11  ;;  %v1055_v13 = vadd.f32 %v1054_v8, %v1053_v6 }
 0x2c5   :  { %v1056_v14 = vpop.f32.mrf.mxu1 }
 0x2c6   :  { %799 = vst.msk [vmem:[%s2030_s3 + $0xd0] sm:$0xff] %vm772_vm0, %v766_v12  ;;  %v735_v18 = vmul.f32 %v1055_v13, %v1833_v63 }
 0x2c7   :  { %v1057_v19 = vpop.f32.mrf.mxu1 }
 0x2c8   :  { %v767_v24 = vadd.f32 %v735_v18, %v1752_v43  ;;  %v1058_v27 = vadd.f32 %v1057_v19, %v1056_v14 }
 0x2c9   :  { %v1059_v30 = vpop.f32.mrf.mxu1 }
 0x2ca   :  { %800 = vst.msk [vmem:[%s2030_s3 + $0xd8] sm:$0xff] %vm772_vm0, %v767_v24  ;;  %v736_v39 = vmul.f32 %v1058_v27, %v1833_v63 }
 0x2cb   :  { %v1060_v40 = vpop.f32.mrf.mxu1 }
 0x2cc   :  { %v768_v45 = vadd.f32 %v736_v39, %v1756_v35  ;;  %v1061_v50 = vadd.f32 %v1060_v40, %v1059_v30 }
 0x2cd   :  { %v1062_v1 = vpop.f32.mrf.mxu1 }
 0x2ce   :  { %801 = vst.msk [vmem:[%s2030_s3 + $0xe0] sm:$0xff] %vm772_vm0, %v768_v45  ;;  %v737_v43 = vmul.f32 %v1061_v50, %v1833_v63 }
 0x2cf   :  { %v1063_v53 = vpop.f32.mrf.mxu1 }
 0x2d0   :  { %v769_v60 = vadd.f32 %v737_v43, %v1760_v36  ;;  %v1064_v56 = vadd.f32 %v1063_v53, %v1062_v1 }
 0x2d1   :  { %v1065_v38 = vpop.f32.mrf.mxu1 }
 0x2d2   :  { %802 = vst.msk [vmem:[%s2030_s3 + $0xe8] sm:$0xff] %vm772_vm0, %v769_v60  ;;  %v738_v35 = vmul.f32 %v1064_v56, %v1833_v63 }
 0x2d3   :  { %v1066_v58 = vpop.f32.mrf.mxu1 }
 0x2d4   :  { %v770_v10 = vadd.f32 %v738_v35, %v1764_v31  ;;  %v1067_v54 = vadd.f32 %v1066_v58, %v1065_v38 }
 0x2d6   :  { %803 = vst.msk [vmem:[%s2030_s3 + $0xf0] sm:$0xff] %vm772_vm0, %v770_v10  ;;  %v739_v36 = vmul.f32 %v1067_v54, %v1833_v63 }
 0x2d8   :  { %v771_v17 = vadd.f32 %v739_v36, %v1768_v48 }
 0x2da   :  { %804 = vst.msk [vmem:[%s2030_s3 + $0xf8] sm:$0xff] %vm772_vm0, %v771_v17 }
 0x2db   :  { %809 = vsyncpa [#allocation3], 1 }

// kernel: lightgcn_forward.3
= control target key start
LH: loop header
LB: loop body
LE: loop exit
PB: predicated region body
PF: predicated region fallthrough
CT: control target
= control target key end

     0   :  { %vm203_vm0 = vcmask 523264   ;;  %vm396_vm1 = vcmask 7168   ;;  %s1280_s0 = inlined_call_operand.vmem [shape: f32[512,64], index: 0, kind: input, shape index: {}]   ;;  %s1281_s1 = inlined_call_operand.vmem [shape: f32[512,64], index: 1, kind: input, shape index: {}]   ;;  %s1282_s2 = inlined_call_operand.vmem [shape: f32[512,1], index: 2, kind: output, shape index: {}]  }
   0x1   :  { %v13_v0 = vld [vmem:[%s1280_s0 + $0x10] sm:$0xff]  ;;  %v11_v2 = vld [vmem:[%s1280_s0] sm:$0xff]  ;;  %v14_v5 = vld [vmem:[%s1280_s0 + $0x18] sm:$0xff] }
   0x2   :  { %v77_v1 = vld [vmem:[%s1281_s1 + $0x10] sm:$0xff]  ;;  %v75_v4 = vld [vmem:[%s1281_s1] sm:$0xff]  ;;  %v78_v6 = vld [vmem:[%s1281_s1 + $0x18] sm:$0xff] }
   0x3   :  { %v141_v3 = vmul.f32 %v77_v1, %v13_v0  ;;  %v139_v7 = vmul.f32 %v75_v4, %v11_v2  ;;  %v142_v8 = vmul.f32 %v78_v6, %v14_v5  ;;  %v12_v9 = vld [vmem:[%s1280_s0 + $0x8] sm:$0xff]  ;;  %v15_v15 = vld [vmem:[%s1280_s0 + $0x20] sm:$0xff]  ;;  %v18_v22 = vld [vmem:[%s1280_s0 + $0x38] sm:$0xff] }
   0x4   :  { %v76_v10 = vld [vmem:[%s1281_s1 + $0x8] sm:$0xff]  ;;  %v79_v16 = vld [vmem:[%s1281_s1 + $0x20] sm:$0xff]  ;;  %v82_v23 = vld [vmem:[%s1281_s1 + $0x38] sm:$0xff] }
   0x5   :  { %v16_v11 = vld [vmem:[%s1280_s0 + $0x28] sm:$0xff]  ;;  %v210_v12 = vsel %vm203_vm0, %v141_v3, 0.0  ;;  %v140_v13 = vmul.f32 %v76_v10, %v12_v9  ;;  %v204_v17 = vsel %vm203_vm0, %v139_v7, 0.0  ;;  %v213_v18 = vsel %vm203_vm0, %v142_v8, 0.0  ;;  %v17_v24 = vld [vmem:[%s1280_s0 + $0x30] sm:$0xff]  ;;  %v19_v32 = vld [vmem:[%s1280_s0 + $0x40] sm:$0xff] }
   0x6   :  { %v80_v14 = vld [vmem:[%s1281_s1 + $0x28] sm:$0xff]  ;;  %211 = vadd.xlane.f32.xlu1 %v210_v12  ;;  %205 = vadd.xlane.f32.xlu0 %v204_v17  ;;  %v143_v21 = vmul.f32 %v79_v16, %v15_v15  ;;  %v81_v25 = vld [vmem:[%s1281_s1 + $0x30] sm:$0xff]  ;;  %v146_v27 = vmul.f32 %v82_v23, %v18_v22  ;;  %v83_v33 = vld [vmem:[%s1281_s1 + $0x40] sm:$0xff] }
   0x7   :  { %v144_v19 = vmul.f32 %v80_v14, %v16_v11  ;;  %v207_v20 = vsel %vm203_vm0, %v140_v13, 0.0  ;;  %v145_v29 = vmul.f32 %v81_v25, %v17_v24  ;;  %v20_v30 = vld [vmem:[%s1280_s0 + $0x48] sm:$0xff]  ;;  %v147_v37 = vmul.f32 %v83_v33, %v19_v32  ;;  %v22_v38 = vld [vmem:[%s1280_s0 + $0x58] sm:$0xff]  ;;  %v21_v40 = vld [vmem:[%s1280_s0 + $0x50] sm:$0xff] }
   0x8   :  { %v216_v28 = vsel %vm203_vm0, %v143_v21, 0.0  ;;  %v84_v31 = vld [vmem:[%s1281_s1 + $0x48] sm:$0xff]  ;;  %v225_v34 = vsel %vm203_vm0, %v146_v27, 0.0  ;;  %v86_v39 = vld [vmem:[%s1281_s1 + $0x58] sm:$0xff]  ;;  %v85_v41 = vld [vmem:[%s1281_s1 + $0x50] sm:$0xff] }
   0x9   :  { %v219_v26 = vsel %vm203_vm0, %v144_v19, 0.0  ;;  %v148_v35 = vmul.f32 %v84_v31, %v20_v30  ;;  %v222_v36 = vsel %vm203_vm0, %v145_v29, 0.0  ;;  %v150_v43 = vmul.f32 %v86_v39, %v22_v38  ;;  %v24_v44 = vld [vmem:[%s1280_s0 + $0x68] sm:$0xff]  ;;  %v23_v48 = vld [vmem:[%s1280_s0 + $0x60] sm:$0xff]  ;;  %v26_v51 = vld [vmem:[%s1280_s0 + $0x78] sm:$0xff] }
   0xa   :  { %214 = vadd.xlane.f32.xlu1 %v213_v18  ;;  %208 = vadd.xlane.f32.xlu0 %v207_v20  ;;  %v88_v45 = vld [vmem:[%s1281_s1 + $0x68] sm:$0xff]  ;;  %v228_v46 = vsel %vm203_vm0, %v147_v37, 0.0  ;;  %v149_v47 = vmul.f32 %v85_v41, %v21_v40  ;;  %v87_v49 = vld [vmem:[%s1281_s1 + $0x60] sm:$0xff]  ;;  %v90_v52 = vld [vmem:[%s1281_s1 + $0x78] sm:$0xff] }
   0xb   :  { %v231_v42 = vsel %vm203_vm0, %v148_v35, 0.0  ;;  %v152_v50 = vmul.f32 %v88_v45, %v24_v44  ;;  %v25_v53 = vld [vmem:[%s1280_s0 + $0x70] sm:$0xff]  ;;  %v237_v54 = vsel %vm203_vm0, %v150_v43, 0.0  ;;  %v151_v55 = vmul.f32 %v87_v49, %v23_v48  ;;  %v44_v57 = vld [vmem:[%s1280_s0 + $0x108] sm:$0xff]  ;;  %v43_v63 = vld [vmem:[%s1280_s0 + $0x100] sm:$0xff] }
   0xc   :  { %v89_v56 = vld [vmem:[%s1281_s1 + $0x70] sm:$0xff]  ;;  %v108_v58 = vld [vmem:[%s1281_s1 + $0x108] sm:$0xff]  ;;  %v234_v59 = vsel %vm203_vm0, %v149_v47, 0.0  ;;  %v107_v0 = vld [vmem:[%s1281_s1 + $0x100] sm:$0xff]  ;;  %v154_v2 = vmul.f32 %v90_v52, %v26_v51 }
   0xd   :  { %v28_v60 = vld [vmem:[%s1280_s0 + $0x88] sm:$0xff]  ;;  %v172_v62 = vmul.f32 %v108_v58, %v44_v57  ;;  %v46_v1 = vld [vmem:[%s1280_s0 + $0x118] sm:$0xff]  ;;  %v171_v3 = vmul.f32 %v107_v0, %v43_v63  ;;  %v45_v5 = vld [vmem:[%s1280_s0 + $0x110] sm:$0xff]  ;;  %v243_v7 = vsel %vm203_vm0, %v152_v50, 0.0  ;;  %v240_v16 = vsel %vm203_vm0, %v151_v55, 0.0 }
   0xe   :  { %220 = vadd.xlane.f32.xlu1 %v219_v26  ;;  %217 = vadd.xlane.f32.xlu0 %v216_v28  ;;  %v92_v61 = vld [vmem:[%s1281_s1 + $0x88] sm:$0xff]  ;;  %v110_v4 = vld [vmem:[%s1281_s1 + $0x118] sm:$0xff]  ;;  %v109_v6 = vld [vmem:[%s1281_s1 + $0x110] sm:$0xff]  ;;  %v153_v17 = vmul.f32 %v89_v56, %v25_v53  ;;  %v249_v32 = vsel %vm203_vm0, %v154_v2, 0.0 }
   0xf   :  { %v27_v8 = vld [vmem:[%s1280_s0 + $0x80] sm:$0xff]  ;;  %v626_v10 = vsel %vm203_vm0, %v172_v62, 0.0  ;;  %v174_v11 = vmul.f32 %v110_v4, %v46_v1  ;;  %v173_v12 = vmul.f32 %v109_v6, %v45_v5  ;;  %v48_v13 = vld [vmem:[%s1280_s0 + $0x128] sm:$0xff]  ;;  %v639_v18 = vsel %vm203_vm0, %v171_v3, 0.0  ;;  %v50_v21 = vld [vmem:[%s1280_s0 + $0x138] sm:$0xff] }
  0x10   :  { %v91_v9 = vld [vmem:[%s1281_s1 + $0x80] sm:$0xff]  ;;  %v112_v14 = vld [vmem:[%s1281_s1 + $0x128] sm:$0xff]  ;;  %v114_v22 = vld [vmem:[%s1281_s1 + $0x138] sm:$0xff]  ;;  %v156_v33 = vmul.f32 %v92_v61, %v28_v60  ;;  %v246_v48 = vsel %vm203_vm0, %v153_v17, 0.0 }
  0x11   :  { %v47_v15 = vld [vmem:[%s1280_s0 + $0x120] sm:$0xff]  ;;  %v176_v19 = vmul.f32 %v112_v14, %v48_v13  ;;  %v30_v23 = vld [vmem:[%s1280_s0 + $0x98] sm:$0xff]  ;;  %v657_v25 = vsel %vm203_vm0, %v174_v11, 0.0  ;;  %v660_v26 = vsel %vm203_vm0, %v173_v12, 0.0  ;;  %v178_v28 = vmul.f32 %v114_v22, %v50_v21  ;;  %v49_v29 = vld [vmem:[%s1280_s0 + $0x130] sm:$0xff] }
  0x12   :  { %226 = vadd.xlane.f32.xlu1 %v225_v34  ;;  %223 = vadd.xlane.f32.xlu0 %v222_v36  ;;  %v111_v20 = vld [vmem:[%s1281_s1 + $0x120] sm:$0xff]  ;;  %v94_v24 = vld [vmem:[%s1281_s1 + $0x98] sm:$0xff]  ;;  %v113_v30 = vld [vmem:[%s1281_s1 + $0x130] sm:$0xff]  ;;  %v155_v49 = vmul.f32 %v91_v9, %v27_v8  ;;  %v255_v0 = vsel %vm203_vm0, %v156_v33, 0.0 }
  0x13   :  { %v175_v27 = vmul.f32 %v111_v20, %v47_v15  ;;  %v52_v31 = vld [vmem:[%s1280_s0 + $0x148] sm:$0xff]  ;;  %v673_v34 = vsel %vm203_vm0, %v176_v19, 0.0  ;;  %v177_v35 = vmul.f32 %v113_v30, %v49_v29  ;;  %v51_v37 = vld [vmem:[%s1280_s0 + $0x140] sm:$0xff]  ;;  %v29_v39 = vld [vmem:[%s1280_s0 + $0x90] sm:$0xff]  ;;  %v158_v1 = vmul.f32 %v94_v24, %v30_v23 }
  0x14   :  { %v116_v36 = vld [vmem:[%s1281_s1 + $0x148] sm:$0xff]  ;;  %v115_v38 = vld [vmem:[%s1281_s1 + $0x140] sm:$0xff]  ;;  %v93_v40 = vld [vmem:[%s1281_s1 + $0x90] sm:$0xff]  ;;  %v252_v17 = vsel %vm203_vm0, %v155_v49, 0.0 }
  0x15   :  { %v691_v41 = vsel %vm203_vm0, %v175_v27, 0.0  ;;  %v180_v43 = vmul.f32 %v116_v36, %v52_v31  ;;  %v179_v44 = vmul.f32 %v115_v38, %v51_v37  ;;  %v54_v45 = vld [vmem:[%s1280_s0 + $0x158] sm:$0xff]  ;;  %v53_v47 = vld [vmem:[%s1280_s0 + $0x150] sm:$0xff]  ;;  %v707_v50 = vsel %vm203_vm0, %v177_v35, 0.0  ;;  %v56_v53 = vld [vmem:[%s1280_s0 + $0x168] sm:$0xff] }
  0x16   :  { %232 = vadd.xlane.f32.xlu1 %v231_v42  ;;  %229 = vadd.xlane.f32.xlu0 %v228_v46  ;;  %v694_v42 = vsel %vm203_vm0, %v178_v28, 0.0  ;;  %v118_v46 = vld [vmem:[%s1281_s1 + $0x158] sm:$0xff]  ;;  %v117_v52 = vld [vmem:[%s1281_s1 + $0x150] sm:$0xff]  ;;  %v32_v55 = vld [vmem:[%s1280_s0 + $0xa8] sm:$0xff]  ;;  %v157_v19 = vmul.f32 %v93_v40, %v29_v39  ;;  %v261_v37 = vsel %vm203_vm0, %v158_v1, 0.0 }
  0x17   :  { %v182_v51 = vmul.f32 %v118_v46, %v54_v45  ;;  %v96_v56 = vld [vmem:[%s1281_s1 + $0xa8] sm:$0xff]  ;;  %v725_v57 = vsel %vm203_vm0, %v180_v43, 0.0  ;;  %v728_v58 = vsel %vm203_vm0, %v179_v44, 0.0  ;;  %v55_v61 = vld [vmem:[%s1280_s0 + $0x160] sm:$0xff]  ;;  %v58_v63 = vld [vmem:[%s1280_s0 + $0x178] sm:$0xff] }
  0x18   :  { %v119_v62 = vld [vmem:[%s1281_s1 + $0x160] sm:$0xff]  ;;  %v122_v4 = vld [vmem:[%s1281_s1 + $0x178] sm:$0xff]  ;;  %v57_v5 = vld [vmem:[%s1280_s0 + $0x170] sm:$0xff]  ;;  %v160_v38 = vmul.f32 %v96_v56, %v32_v55  ;;  %v258_v56 = vsel %vm203_vm0, %v157_v19, 0.0 }
  0x19   :  { %v741_v2 = vsel %vm203_vm0, %v182_v51, 0.0  ;;  %v183_v3 = vmul.f32 %v119_v62, %v55_v61  ;;  %v121_v6 = vld [vmem:[%s1281_s1 + $0x170] sm:$0xff]  ;;  %v95_v8 = vld [vmem:[%s1281_s1 + $0xa0] sm:$0xff]  ;;  %v186_v12 = vmul.f32 %v122_v4, %v58_v63  ;;  %v60_v14 = vld [vmem:[%s1280_s0 + $0x188] sm:$0xff] }
  0x1a   :  { %238 = vadd.xlane.f32.xlu1 %v237_v54  ;;  %235 = vadd.xlane.f32.xlu0 %v234_v59  ;;  %v120_v54 = vld [vmem:[%s1281_s1 + $0x168] sm:$0xff]  ;;  %v181_v59 = vmul.f32 %v117_v52, %v53_v47  ;;  %v185_v13 = vmul.f32 %v121_v6, %v57_v5  ;;  %v123_v22 = vld [vmem:[%s1281_s1 + $0x180] sm:$0xff]  ;;  %v62_v23 = vld [vmem:[%s1280_s0 + $0x198] sm:$0xff] }
  0x1b   :  { %v184_v60 = vmul.f32 %v120_v54, %v56_v53  ;;  %v124_v15 = vld [vmem:[%s1281_s1 + $0x188] sm:$0xff]  ;;  %v775_v20 = vsel %vm203_vm0, %v183_v3, 0.0  ;;  %v126_v24 = vld [vmem:[%s1281_s1 + $0x198] sm:$0xff]  ;;  %v793_v29 = vsel %vm203_vm0, %v186_v12, 0.0  ;;  %v61_v33 = vld [vmem:[%s1280_s0 + $0x190] sm:$0xff]  ;;  %v267_v12 = vsel %vm203_vm0, %v160_v38, 0.0 }
  0x1c   :  { %v759_v9 = vsel %vm203_vm0, %v181_v59, 0.0  ;;  %v188_v21 = vmul.f32 %v124_v15, %v60_v14  ;;  %v34_v27 = vld [vmem:[%s1280_s0 + $0xb8] sm:$0xff]  ;;  %v796_v30 = vsel %vm203_vm0, %v185_v13, 0.0  ;;  %v125_v35 = vld [vmem:[%s1281_s1 + $0x190] sm:$0xff]  ;;  %v64_v36 = vld [vmem:[%s1280_s0 + $0x1a8] sm:$0xff] }
  0x1d   :  { %v762_v11 = vsel %vm203_vm0, %v184_v60, 0.0  ;;  %v98_v28 = vld [vmem:[%s1281_s1 + $0xb8] sm:$0xff]  ;;  %v189_v40 = vmul.f32 %v125_v35, %v61_v33  ;;  %v128_v43 = vld [vmem:[%s1281_s1 + $0x1a8] sm:$0xff]  ;;  %v63_v44 = vld [vmem:[%s1280_s0 + $0x1a0] sm:$0xff] }
  0x1e   :  { %244 = vadd.xlane.f32.xlu1 %v243_v7  ;;  %241 = vadd.xlane.f32.xlu0 %v240_v16  ;;  %v31_v7 = vld [vmem:[%s1280_s0 + $0xa0] sm:$0xff]  ;;  %v809_v39 = vsel %vm203_vm0, %v188_v21, 0.0  ;;  %v33_v46 = vld [vmem:[%s1280_s0 + $0xb0] sm:$0xff]  ;;  %v192_v51 = vmul.f32 %v128_v43, %v64_v36  ;;  %v66_v53 = vld [vmem:[%s1280_s0 + $0x1b8] sm:$0xff]  ;;  %v162_v13 = vmul.f32 %v98_v28, %v34_v27 }
  0x1f   :  { %v59_v16 = vld [vmem:[%s1280_s0 + $0x180] sm:$0xff]  ;;  %v97_v47 = vld [vmem:[%s1281_s1 + $0xb0] sm:$0xff]  ;;  %v130_v54 = vld [vmem:[%s1281_s1 + $0x1b8] sm:$0xff]  ;;  %v159_v59 = vmul.f32 %v95_v8, %v31_v7  ;;  %v843_v60 = vsel %vm203_vm0, %v189_v40, 0.0 }
  0x20   :  { %v187_v31 = vmul.f32 %v123_v22, %v59_v16  ;;  %v127_v45 = vld [vmem:[%s1281_s1 + $0x1a0] sm:$0xff]  ;;  %v65_v55 = vld [vmem:[%s1280_s0 + $0x1b0] sm:$0xff]  ;;  %v194_v61 = vmul.f32 %v130_v54, %v66_v53  ;;  %v68_v63 = vld [vmem:[%s1280_s0 + $0x1c8] sm:$0xff]  ;;  %v855_v1 = vsel %vm203_vm0, %v192_v51, 0.0  ;;  %v161_v35 = vmul.f32 %v97_v47, %v33_v46 }
  0x21   :  { %v191_v52 = vmul.f32 %v127_v45, %v63_v44  ;;  %v129_v62 = vld [vmem:[%s1281_s1 + $0x1b0] sm:$0xff]  ;;  %v67_v6 = vld [vmem:[%s1280_s0 + $0x1c0] sm:$0xff]  ;;  %v70_v8 = vld [vmem:[%s1280_s0 + $0x1d8] sm:$0xff]  ;;  %v264_v33 = vsel %vm203_vm0, %v159_v59, 0.0 }
  0x22   :  { %250 = vadd.xlane.f32.xlu1 %v249_v32  ;;  %247 = vadd.xlane.f32.xlu0 %v246_v48  ;;  %v190_v32 = vmul.f32 %v126_v24, %v62_v23  ;;  %v827_v48 = vsel %vm203_vm0, %v187_v31, 0.0  ;;  %v193_v4 = vmul.f32 %v129_v62, %v65_v55  ;;  %v131_v7 = vld [vmem:[%s1281_s1 + $0x1c0] sm:$0xff]  ;;  %v871_v14 = vsel %vm203_vm0, %v194_v61, 0.0  ;;  %v134_v16 = vld [vmem:[%s1281_s1 + $0x1d8] sm:$0xff]  ;;  %v133_v19 = vld [vmem:[%s1281_s1 + $0x1d0] sm:$0xff] }
  0x23   :  { %v858_v3 = vsel %vm203_vm0, %v191_v52, 0.0  ;;  %v195_v15 = vmul.f32 %v131_v7, %v67_v6  ;;  %v36_v21 = vld [vmem:[%s1280_s0 + $0xc8] sm:$0xff]  ;;  %v198_v24 = vmul.f32 %v134_v16, %v70_v8  ;;  %v135_v38 = vld [vmem:[%s1281_s1 + $0x1e0] sm:$0xff]  ;;  %v74_v40 = vld [vmem:[%s1280_s0 + $0x1f8] sm:$0xff] }
  0x24   :  { %v830_v49 = vsel %vm203_vm0, %v190_v32, 0.0  ;;  %v886_v22 = vsel %vm203_vm0, %v193_v4, 0.0  ;;  %v72_v28 = vld [vmem:[%s1280_s0 + $0x1e8] sm:$0xff]  ;;  %v71_v32 = vld [vmem:[%s1280_s0 + $0x1e0] sm:$0xff]  ;;  %v138_v43 = vld [vmem:[%s1281_s1 + $0x1f8] sm:$0xff] }
  0x25   :  { %v136_v31 = vld [vmem:[%s1281_s1 + $0x1e8] sm:$0xff]  ;;  %v902_v36 = vsel %vm203_vm0, %v195_v15, 0.0  ;;  %v917_v45 = vsel %vm203_vm0, %v198_v24, 0.0  ;;  %v199_v47 = vmul.f32 %v135_v38, %v71_v32  ;;  %v202_v51 = vmul.f32 %v138_v43, %v74_v40  ;;  %v73_v52 = vld [vmem:[%s1280_s0 + $0x1f0] sm:$0xff]  ;;  %v35_v54 = vld [vmem:[%s1280_s0 + $0xc0] sm:$0xff] }
  0x26   :  { %256 = vadd.xlane.f32.xlu1 %v255_v0  ;;  %253 = vadd.xlane.f32.xlu0 %v252_v17  ;;  %v132_v0 = vld [vmem:[%s1281_s1 + $0x1c8] sm:$0xff]  ;;  %v69_v17 = vld [vmem:[%s1280_s0 + $0x1d0] sm:$0xff]  ;;  %v99_v55 = vld [vmem:[%s1281_s1 + $0xc0] sm:$0xff] }
  0x27   :  { %v196_v5 = vmul.f32 %v132_v0, %v68_v63  ;;  %v197_v27 = vmul.f32 %v133_v19, %v69_v17  ;;  %v100_v44 = vld [vmem:[%s1281_s1 + $0xc8] sm:$0xff]  ;;  %v137_v53 = vld [vmem:[%s1281_s1 + $0x1f0] sm:$0xff]  ;;  %v938_v61 = vsel %vm203_vm0, %v199_v47, 0.0  ;;  %v941_v62 = vsel %vm203_vm0, %v202_v51, 0.0  ;;  %v38_v7 = vld [vmem:[%s1280_s0 + $0xd8] sm:$0xff] }
  0x28   :  { %v201_v59 = vmul.f32 %v137_v53, %v73_v52  ;;  %v273_v63 = vsel %vm203_vm0, %v162_v13, 0.0  ;;  %v164_v0 = vmul.f32 %v100_v44, %v36_v21  ;;  %v163_v6 = vmul.f32 %v99_v55, %v35_v54  ;;  %v102_v8 = vld [vmem:[%s1281_s1 + $0xd8] sm:$0xff]  ;;  %v101_v13 = vld [vmem:[%s1281_s1 + $0xd0] sm:$0xff]  ;;  %v40_v21 = vld [vmem:[%s1280_s0 + $0xe8] sm:$0xff] }
  0x29   :  { %v889_v23 = vsel %vm203_vm0, %v196_v5, 0.0  ;;  %v920_v46 = vsel %vm203_vm0, %v197_v27, 0.0  ;;  %v270_v5 = vsel %vm203_vm0, %v161_v35, 0.0  ;;  %v166_v16 = vmul.f32 %v102_v8, %v38_v7  ;;  %v104_v24 = vld [vmem:[%s1281_s1 + $0xe8] sm:$0xff]  ;;  %v39_v27 = vld [vmem:[%s1280_s0 + $0xe0] sm:$0xff]  ;;  %v106_v38 = vld [vmem:[%s1281_s1 + $0xf8] sm:$0xff] }
  0x2a   :  { %262 = vadd.xlane.f32.xlu1 %v261_v37  ;;  %259 = vadd.xlane.f32.xlu0 %v258_v56  ;;  %v200_v37 = vmul.f32 %v136_v31, %v72_v28  ;;  %v945_v4 = vsel %vm203_vm0, %v201_v59, 0.0  ;;  %v279_v15 = vsel %vm203_vm0, %v164_v0, 0.0  ;;  %v276_v17 = vsel %vm203_vm0, %v163_v6, 0.0  ;;  %v103_v28 = vld [vmem:[%s1281_s1 + $0xe0] sm:$0xff]  ;;  %v41_v40 = vld [vmem:[%s1280_s0 + $0xf0] sm:$0xff] }
  0x2b   :  { %v285_v31 = vsel %vm203_vm0, %v166_v16, 0.0  ;;  %v168_v32 = vmul.f32 %v104_v24, %v40_v21  ;;  %v167_v35 = vmul.f32 %v103_v28, %v39_v27  ;;  %v105_v43 = vld [vmem:[%s1281_s1 + $0xf0] sm:$0xff] }
  0x2c   :  { %v935_v56 = vsel %vm203_vm0, %v200_v37, 0.0  ;;  %v42_v37 = vld [vmem:[%s1280_s0 + $0xf8] sm:$0xff]  ;;  %v169_v52 = vmul.f32 %v105_v43, %v41_v40 }
  0x2d   :  { %v291_v44 = vsel %vm203_vm0, %v168_v32, 0.0  ;;  %v170_v47 = vmul.f32 %v106_v38, %v42_v37  ;;  %v288_v51 = vsel %vm203_vm0, %v167_v35, 0.0 }
  0x2e   :  { %268 = vadd.xlane.f32.xlu1 %v267_v12  ;;  %265 = vadd.xlane.f32.xlu0 %v264_v33  ;;  %v37_v12 = vld [vmem:[%s1280_s0 + $0xd0] sm:$0xff]  ;;  %v294_v54 = vsel %vm203_vm0, %v169_v52, 0.0 }
  0x2f   :  { %v165_v19 = vmul.f32 %v101_v13, %v37_v12  ;;  %v297_v53 = vsel %vm203_vm0, %v170_v47, 0.0 }
  0x31   :  { %v282_v33 = vsel %vm203_vm0, %v165_v19, 0.0 }
  0x32   :  { %274 = vadd.xlane.f32.xlu1 %v273_v63  ;;  %271 = vadd.xlane.f32.xlu0 %v270_v5 }
  0x36   :  { %280 = vadd.xlane.f32.xlu1 %v279_v15  ;;  %277 = vadd.xlane.f32.xlu0 %v276_v17 }
  0x3a   :  { %286 = vadd.xlane.f32.xlu1 %v285_v31  ;;  %283 = vadd.xlane.f32.xlu0 %v282_v33 }
  0x3e   :  { %292 = vadd.xlane.f32.xlu1 %v291_v44  ;;  %289 = vadd.xlane.f32.xlu0 %v288_v51 }
  0x42   :  { %298 = vadd.xlane.f32.xlu1 %v297_v53  ;;  %295 = vadd.xlane.f32.xlu0 %v294_v54 }
  0x46   :  { %304 = vadd.xlane.f32.xlu1 %v626_v10  ;;  %301 = vadd.xlane.f32.xlu0 %v639_v18 }
  0x4a   :  { %310 = vadd.xlane.f32.xlu1 %v657_v25  ;;  %307 = vadd.xlane.f32.xlu0 %v660_v26 }
  0x4e   :  { %316 = vadd.xlane.f32.xlu1 %v673_v34  ;;  %313 = vadd.xlane.f32.xlu0 %v691_v41 }
  0x52   :  { %322 = vadd.xlane.f32.xlu1 %v694_v42  ;;  %319 = vadd.xlane.f32.xlu0 %v707_v50 }
  0x56   :  { %328 = vadd.xlane.f32.xlu1 %v725_v57  ;;  %325 = vadd.xlane.f32.xlu0 %v728_v58 }
  0x5a   :  { %334 = vadd.xlane.f32.xlu1 %v741_v2  ;;  %331 = vadd.xlane.f32.xlu0 %v759_v9 }
  0x5e   :  { %340 = vadd.xlane.f32.xlu1 %v762_v11  ;;  %337 = vadd.xlane.f32.xlu0 %v775_v20 }
  0x62   :  { %346 = vadd.xlane.f32.xlu1 %v793_v29  ;;  %343 = vadd.xlane.f32.xlu0 %v796_v30 }
  0x66   :  { %352 = vadd.xlane.f32.xlu1 %v809_v39  ;;  %349 = vadd.xlane.f32.xlu0 %v827_v48 }
  0x6a   :  { %358 = vadd.xlane.f32.xlu1 %v830_v49  ;;  %355 = vadd.xlane.f32.xlu0 %v843_v60 }
  0x6e   :  { %364 = vadd.xlane.f32.xlu1 %v855_v1  ;;  %361 = vadd.xlane.f32.xlu0 %v858_v3 }
  0x72   :  { %370 = vadd.xlane.f32.xlu1 %v871_v14  ;;  %367 = vadd.xlane.f32.xlu0 %v886_v22 }
  0x76   :  { %376 = vadd.xlane.f32.xlu1 %v889_v23  ;;  %373 = vadd.xlane.f32.xlu0 %v902_v36 }
  0x7a   :  { %382 = vadd.xlane.f32.xlu1 %v917_v45  ;;  %379 = vadd.xlane.f32.xlu0 %v920_v46 }
  0x7e   :  { %388 = vadd.xlane.f32.xlu1 %v935_v56  ;;  %385 = vadd.xlane.f32.xlu0 %v938_v61 }
  0x82   :  { %394 = vadd.xlane.f32.xlu1 %v941_v62  ;;  %391 = vadd.xlane.f32.xlu0 %v945_v4 }
  0x8f   :  { %v212_v10 = vpop.xlane.xlu1 %211  ;;  %v206_v18 = vpop.xlane.xlu0 %205 }
  0x90   :  { %399 = vst.msk [vmem:[%s1282_s2 + $0x10] sm:$0xff] %vm396_vm1, %v212_v10  ;;  %397 = vst.msk [vmem:[%s1282_s2] sm:$0xff] %vm396_vm1, %v206_v18 }
  0x93   :  { %v215_v25 = vpop.xlane.xlu1 %214  ;;  %v209_v26 = vpop.xlane.xlu0 %208 }
  0x94   :  { %400 = vst.msk [vmem:[%s1282_s2 + $0x18] sm:$0xff] %vm396_vm1, %v215_v25  ;;  %398 = vst.msk [vmem:[%s1282_s2 + $0x8] sm:$0xff] %vm396_vm1, %v209_v26 }
  0x97   :  { %v221_v34 = vpop.xlane.xlu1 %220  ;;  %v218_v41 = vpop.xlane.xlu0 %217 }
  0x98   :  { %402 = vst.msk [vmem:[%s1282_s2 + $0x28] sm:$0xff] %vm396_vm1, %v221_v34  ;;  %401 = vst.msk [vmem:[%s1282_s2 + $0x20] sm:$0xff] %vm396_vm1, %v218_v41 }
  0x9b   :  { %v227_v42 = vpop.xlane.xlu1 %226  ;;  %v224_v50 = vpop.xlane.xlu0 %223 }
  0x9c   :  { %404 = vst.msk [vmem:[%s1282_s2 + $0x38] sm:$0xff] %vm396_vm1, %v227_v42  ;;  %403 = vst.msk [vmem:[%s1282_s2 + $0x30] sm:$0xff] %vm396_vm1, %v224_v50 }
  0x9f   :  { %v233_v57 = vpop.xlane.xlu1 %232  ;;  %v230_v58 = vpop.xlane.xlu0 %229 }
  0xa0   :  { %406 = vst.msk [vmem:[%s1282_s2 + $0x48] sm:$0xff] %vm396_vm1, %v233_v57  ;;  %405 = vst.msk [vmem:[%s1282_s2 + $0x40] sm:$0xff] %vm396_vm1, %v230_v58 }
  0xa3   :  { %v239_v2 = vpop.xlane.xlu1 %238  ;;  %v236_v9 = vpop.xlane.xlu0 %235 }
  0xa4   :  { %408 = vst.msk [vmem:[%s1282_s2 + $0x58] sm:$0xff] %vm396_vm1, %v239_v2  ;;  %407 = vst.msk [vmem:[%s1282_s2 + $0x50] sm:$0xff] %vm396_vm1, %v236_v9 }
  0xa7   :  { %v245_v11 = vpop.xlane.xlu1 %244  ;;  %v242_v20 = vpop.xlane.xlu0 %241 }
  0xa8   :  { %410 = vst.msk [vmem:[%s1282_s2 + $0x68] sm:$0xff] %vm396_vm1, %v245_v11  ;;  %409 = vst.msk [vmem:[%s1282_s2 + $0x60] sm:$0xff] %vm396_vm1, %v242_v20 }
  0xab   :  { %v251_v29 = vpop.xlane.xlu1 %250  ;;  %v248_v30 = vpop.xlane.xlu0 %247 }
  0xac   :  { %412 = vst.msk [vmem:[%s1282_s2 + $0x78] sm:$0xff] %vm396_vm1, %v251_v29  ;;  %411 = vst.msk [vmem:[%s1282_s2 + $0x70] sm:$0xff] %vm396_vm1, %v248_v30 }
  0xaf   :  { %v257_v39 = vpop.xlane.xlu1 %256  ;;  %v254_v48 = vpop.xlane.xlu0 %253 }
  0xb0   :  { %414 = vst.msk [vmem:[%s1282_s2 + $0x88] sm:$0xff] %vm396_vm1, %v257_v39  ;;  %413 = vst.msk [vmem:[%s1282_s2 + $0x80] sm:$0xff] %vm396_vm1, %v254_v48 }
  0xb3   :  { %v263_v49 = vpop.xlane.xlu1 %262  ;;  %v260_v60 = vpop.xlane.xlu0 %259 }
  0xb4   :  { %416 = vst.msk [vmem:[%s1282_s2 + $0x98] sm:$0xff] %vm396_vm1, %v263_v49  ;;  %415 = vst.msk [vmem:[%s1282_s2 + $0x90] sm:$0xff] %vm396_vm1, %v260_v60 }
  0xb7   :  { %v269_v1 = vpop.xlane.xlu1 %268  ;;  %v266_v3 = vpop.xlane.xlu0 %265 }
  0xb8   :  { %418 = vst.msk [vmem:[%s1282_s2 + $0xa8] sm:$0xff] %vm396_vm1, %v269_v1  ;;  %417 = vst.msk [vmem:[%s1282_s2 + $0xa0] sm:$0xff] %vm396_vm1, %v266_v3 }
  0xbb   :  { %v275_v14 = vpop.xlane.xlu1 %274  ;;  %v272_v22 = vpop.xlane.xlu0 %271 }
  0xbc   :  { %420 = vst.msk [vmem:[%s1282_s2 + $0xb8] sm:$0xff] %vm396_vm1, %v275_v14  ;;  %419 = vst.msk [vmem:[%s1282_s2 + $0xb0] sm:$0xff] %vm396_vm1, %v272_v22 }
  0xbf   :  { %v281_v23 = vpop.xlane.xlu1 %280  ;;  %v278_v36 = vpop.xlane.xlu0 %277 }
  0xc0   :  { %422 = vst.msk [vmem:[%s1282_s2 + $0xc8] sm:$0xff] %vm396_vm1, %v281_v23  ;;  %421 = vst.msk [vmem:[%s1282_s2 + $0xc0] sm:$0xff] %vm396_vm1, %v278_v36 }
  0xc3   :  { %v287_v45 = vpop.xlane.xlu1 %286  ;;  %v284_v46 = vpop.xlane.xlu0 %283 }
  0xc4   :  { %424 = vst.msk [vmem:[%s1282_s2 + $0xd8] sm:$0xff] %vm396_vm1, %v287_v45  ;;  %423 = vst.msk [vmem:[%s1282_s2 + $0xd0] sm:$0xff] %vm396_vm1, %v284_v46 }
  0xc7   :  { %v293_v55 = vpop.xlane.xlu1 %292  ;;  %v290_v56 = vpop.xlane.xlu0 %289 }
  0xc8   :  { %426 = vst.msk [vmem:[%s1282_s2 + $0xe8] sm:$0xff] %vm396_vm1, %v293_v55  ;;  %425 = vst.msk [vmem:[%s1282_s2 + $0xe0] sm:$0xff] %vm396_vm1, %v290_v56 }
  0xcb   :  { %v299_v59 = vpop.xlane.xlu1 %298  ;;  %v296_v61 = vpop.xlane.xlu0 %295 }
  0xcc   :  { %428 = vst.msk [vmem:[%s1282_s2 + $0xf8] sm:$0xff] %vm396_vm1, %v299_v59  ;;  %427 = vst.msk [vmem:[%s1282_s2 + $0xf0] sm:$0xff] %vm396_vm1, %v296_v61 }
  0xcf   :  { %v305_v62 = vpop.xlane.xlu1 %304  ;;  %v302_v63 = vpop.xlane.xlu0 %301 }
  0xd0   :  { %430 = vst.msk [vmem:[%s1282_s2 + $0x108] sm:$0xff] %vm396_vm1, %v305_v62  ;;  %429 = vst.msk [vmem:[%s1282_s2 + $0x100] sm:$0xff] %vm396_vm1, %v302_v63 }
  0xd3   :  { %v311_v0 = vpop.xlane.xlu1 %310  ;;  %v308_v4 = vpop.xlane.xlu0 %307 }
  0xd4   :  { %432 = vst.msk [vmem:[%s1282_s2 + $0x118] sm:$0xff] %vm396_vm1, %v311_v0  ;;  %431 = vst.msk [vmem:[%s1282_s2 + $0x110] sm:$0xff] %vm396_vm1, %v308_v4 }
  0xd7   :  { %v317_v5 = vpop.xlane.xlu1 %316  ;;  %v314_v6 = vpop.xlane.xlu0 %313 }
  0xd8   :  { %434 = vst.msk [vmem:[%s1282_s2 + $0x128] sm:$0xff] %vm396_vm1, %v317_v5  ;;  %433 = vst.msk [vmem:[%s1282_s2 + $0x120] sm:$0xff] %vm396_vm1, %v314_v6 }
  0xdb   :  { %v323_v7 = vpop.xlane.xlu1 %322  ;;  %v320_v8 = vpop.xlane.xlu0 %319 }
  0xdc   :  { %436 = vst.msk [vmem:[%s1282_s2 + $0x138] sm:$0xff] %vm396_vm1, %v323_v7  ;;  %435 = vst.msk [vmem:[%s1282_s2 + $0x130] sm:$0xff] %vm396_vm1, %v320_v8 }
  0xdf   :  { %v329_v12 = vpop.xlane.xlu1 %328  ;;  %v326_v13 = vpop.xlane.xlu0 %325 }
  0xe0   :  { %438 = vst.msk [vmem:[%s1282_s2 + $0x148] sm:$0xff] %vm396_vm1, %v329_v12  ;;  %437 = vst.msk [vmem:[%s1282_s2 + $0x140] sm:$0xff] %vm396_vm1, %v326_v13 }
  0xe3   :  { %v335_v15 = vpop.xlane.xlu1 %334  ;;  %v332_v16 = vpop.xlane.xlu0 %331 }
  0xe4   :  { %440 = vst.msk [vmem:[%s1282_s2 + $0x158] sm:$0xff] %vm396_vm1, %v335_v15  ;;  %439 = vst.msk [vmem:[%s1282_s2 + $0x150] sm:$0xff] %vm396_vm1, %v332_v16 }
  0xe7   :  { %v341_v17 = vpop.xlane.xlu1 %340  ;;  %v338_v19 = vpop.xlane.xlu0 %337 }
  0xe8   :  { %442 = vst.msk [vmem:[%s1282_s2 + $0x168] sm:$0xff] %vm396_vm1, %v341_v17  ;;  %441 = vst.msk [vmem:[%s1282_s2 + $0x160] sm:$0xff] %vm396_vm1, %v338_v19 }
  0xeb   :  { %v347_v21 = vpop.xlane.xlu1 %346  ;;  %v344_v24 = vpop.xlane.xlu0 %343 }
  0xec   :  { %444 = vst.msk [vmem:[%s1282_s2 + $0x178] sm:$0xff] %vm396_vm1, %v347_v21  ;;  %443 = vst.msk [vmem:[%s1282_s2 + $0x170] sm:$0xff] %vm396_vm1, %v344_v24 }
  0xef   :  { %v353_v27 = vpop.xlane.xlu1 %352  ;;  %v350_v28 = vpop.xlane.xlu0 %349 }
  0xf0   :  { %446 = vst.msk [vmem:[%s1282_s2 + $0x188] sm:$0xff] %vm396_vm1, %v353_v27  ;;  %445 = vst.msk [vmem:[%s1282_s2 + $0x180] sm:$0xff] %vm396_vm1, %v350_v28 }
  0xf3   :  { %v359_v31 = vpop.xlane.xlu1 %358  ;;  %v356_v32 = vpop.xlane.xlu0 %355 }
  0xf4   :  { %448 = vst.msk [vmem:[%s1282_s2 + $0x198] sm:$0xff] %vm396_vm1, %v359_v31  ;;  %447 = vst.msk [vmem:[%s1282_s2 + $0x190] sm:$0xff] %vm396_vm1, %v356_v32 }
  0xf7   :  { %v365_v33 = vpop.xlane.xlu1 %364  ;;  %v362_v35 = vpop.xlane.xlu0 %361 }
  0xf8   :  { %450 = vst.msk [vmem:[%s1282_s2 + $0x1a8] sm:$0xff] %vm396_vm1, %v365_v33  ;;  %449 = vst.msk [vmem:[%s1282_s2 + $0x1a0] sm:$0xff] %vm396_vm1, %v362_v35 }
  0xfb   :  { %v371_v37 = vpop.xlane.xlu1 %370  ;;  %v368_v38 = vpop.xlane.xlu0 %367 }
  0xfc   :  { %452 = vst.msk [vmem:[%s1282_s2 + $0x1b8] sm:$0xff] %vm396_vm1, %v371_v37  ;;  %451 = vst.msk [vmem:[%s1282_s2 + $0x1b0] sm:$0xff] %vm396_vm1, %v368_v38 }
  0xff   :  { %v377_v40 = vpop.xlane.xlu1 %376  ;;  %v374_v43 = vpop.xlane.xlu0 %373 }
 0x100   :  { %454 = vst.msk [vmem:[%s1282_s2 + $0x1c8] sm:$0xff] %vm396_vm1, %v377_v40  ;;  %453 = vst.msk [vmem:[%s1282_s2 + $0x1c0] sm:$0xff] %vm396_vm1, %v374_v43 }
 0x103   :  { %v383_v44 = vpop.xlane.xlu1 %382  ;;  %v380_v47 = vpop.xlane.xlu0 %379 }
 0x104   :  { %456 = vst.msk [vmem:[%s1282_s2 + $0x1d8] sm:$0xff] %vm396_vm1, %v383_v44  ;;  %455 = vst.msk [vmem:[%s1282_s2 + $0x1d0] sm:$0xff] %vm396_vm1, %v380_v47 }
 0x107   :  { %v389_v51 = vpop.xlane.xlu1 %388  ;;  %v386_v52 = vpop.xlane.xlu0 %385 }
 0x108   :  { %458 = vst.msk [vmem:[%s1282_s2 + $0x1e8] sm:$0xff] %vm396_vm1, %v389_v51  ;;  %457 = vst.msk [vmem:[%s1282_s2 + $0x1e0] sm:$0xff] %vm396_vm1, %v386_v52 }
 0x10b   :  { %v395_v53 = vpop.xlane.xlu1 %394  ;;  %v392_v54 = vpop.xlane.xlu0 %391 }
 0x10c   :  { %460 = vst.msk [vmem:[%s1282_s2 + $0x1f8] sm:$0xff] %vm396_vm1, %v395_v53  ;;  %459 = vst.msk [vmem:[%s1282_s2 + $0x1f0] sm:$0xff] %vm396_vm1, %v392_v54 }

</bundles_post_ra>
